<compile_context>
chip_gen: v5e
topology: v5e:2x2
jax: 0.10.0
libtpu: 0.0.40
codegen_flags: <defaults>
</compile_context>

<pallas_src>
import functools

import jax
import jax.numpy as jnp
from jax import lax
from jax.experimental import pallas as pl
from jax.experimental.pallas import tpu as pltpu

EPS = 1e-5
FOLD = 128                               # lane-dense fold width for activation slabs
VMEM_LIMIT_BYTES = 32 * 1024 * 1024      # inside v7x's 64 MiB (and v5e/v6e's 128 MiB)


def _cparams(grid_rank=1):
    return pltpu.CompilerParams(
        dimension_semantics=("parallel",) * grid_rank,
        vmem_limit_bytes=VMEM_LIMIT_BYTES,
    )


# ---------------------------------------------------------------------------
# Kernels
# ---------------------------------------------------------------------------
def _conv_stats_kernel(x_ref, w_ref, z_ref, psum_ref, psq_ref):
    """3x3 'SAME' conv for a chunk of images + per-chunk BN partial statistics.

    x_ref   : (ipb, H, W, C)   un-padded NHWC (bf16 in the fast path)
    w_ref   : (9*C, C)         dense per-tap weights, tap order (dy, kx, ci)
    z_ref   : (ipb, H*W, C)    conv output (bf16 in the fast path)
    psum_ref, psq_ref : (1, 1, C) f32 per-chunk column sums / sums of squares
    """
    ipb, h, w, c = x_ref.shape
    k = w_ref.shape[0]                                    # 9*C

    pieces = []
    for i in range(ipb):                                  # static unroll over the chunk
        x = x_ref[i]                                      # (H, W, C)
        zcol = jnp.zeros((h, 1, c), x.dtype)
        zrow = jnp.zeros((1, w + 2, c), x.dtype)
        xp = jnp.concatenate([zcol, x, zcol], axis=1)     # (H,   W+2, C)  zero borders
        xp = jnp.concatenate([zrow, xp, zrow], axis=0)    # (H+2, W+2, C)  built in VMEM
        # Shifted bf16 slices (sliced BEFORE the matmul), concatenated over the 9 taps.
        taps = [xp[dy:dy + h, kx:kx + w, :]
                for dy in range(3) for kx in range(3)]
        lhs_i = jnp.concatenate(taps, axis=-1)            # (H, W, 9C)
        pieces.append(lhs_i.reshape(h * w, k))            # leading-dim collapse only
    lhs = pieces[0] if ipb == 1 else jnp.concatenate(pieces, axis=0)

    # Single MXU matmul per grid step, f32 accumulation (M = ipb*H*W, K = 9C, N = C).
    acc = jnp.dot(lhs, w_ref[...], preferred_element_type=jnp.float32)

    z_ref[...] = acc.reshape(ipb, h * w, c).astype(z_ref.dtype)
    psum_ref[0] = jnp.sum(acc, axis=0, keepdims=True)        # (1, C)
    psq_ref[0] = jnp.sum(acc * acc, axis=0, keepdims=True)   # (1, C)


def _channel_tile(vec_ref, lanes):
    """(1, C) -> (1, lanes) by lane-repeating the per-channel vector (hoisted once)."""
    v = vec_ref[...]
    while v.shape[-1] < lanes:                            # 128//C is a power of two
        v = jnp.concatenate([v, v], axis=-1)
    return v


def _bn_relu_kernel(z_ref, scale_ref, shift_ref, out_ref):
    lanes = z_ref.shape[-1]
    scale = _channel_tile(scale_ref, lanes)
    shift = _channel_tile(shift_ref, lanes)
    y = jnp.maximum(z_ref[...] * scale + shift, 0.0)
    out_ref[...] = y.astype(out_ref.dtype)


def _bn_res_relu_kernel(z_ref, res_ref, scale_ref, shift_ref, out_ref):
    lanes = z_ref.shape[-1]
    scale = _channel_tile(scale_ref, lanes)
    shift = _channel_tile(shift_ref, lanes)
    y = z_ref[...] * scale + shift + res_ref[...]
    out_ref[...] = jnp.maximum(y, 0.0).astype(out_ref.dtype)


# ---------------------------------------------------------------------------
# pallas_call wrappers
# ---------------------------------------------------------------------------
def _images_per_step(n, h, w, c, itemsize):
    """Biggest image chunk per conv step (large MXU M, few steps on 1-TC v5e/v6e)
    while keeping >= 2 parallel grid steps when possible (both v7x TensorCores)."""
    budget = 4 * 1024 * 1024              # VMEM bytes allowed for the in-kernel patches
    best = 1
    for ipb in range(1, n + 1):
        if n % ipb != 0:
            continue
        if n // ipb < 2 and n >= 2:
            continue
        if ipb * h * w * 9 * c * itemsize > budget:
            continue
        best = ipb
    return best


def _conv_stats(x_nhwc, w9, z_dtype):
    n, h, w, c = x_nhwc.shape
    ipb = _images_per_step(n, h, w, c, jnp.dtype(x_nhwc.dtype).itemsize)
    steps = n // ipb
    return pl.pallas_call(
        _conv_stats_kernel,
        grid=(steps,),
        in_specs=[
            pl.BlockSpec((ipb, h, w, c), lambda i: (i, 0, 0, 0)),   # image chunk
            pl.BlockSpec((9 * c, c), lambda i: (0, 0)),             # resident dense weights
        ],
        out_specs=[
            pl.BlockSpec((ipb, h * w, c), lambda i: (i, 0, 0)),     # conv output
            pl.BlockSpec((1, 1, c), lambda i: (i, 0, 0)),           # per-chunk sums
            pl.BlockSpec((1, 1, c), lambda i: (i, 0, 0)),           # per-chunk sumsq
        ],
        out_shape=[
            jax.ShapeDtypeStruct((n, h * w, c), z_dtype),
            jax.ShapeDtypeStruct((steps, 1, c), jnp.float32),
            jax.ShapeDtypeStruct((steps, 1, c), jnp.float32),
        ],
        compiler_params=_cparams(1),
    )(x_nhwc, w9)


def _bn_affine(psum, psq, gamma, beta, count):
    """Tiny XLA fold: partial sums -> per-channel (1, C) scale / shift (training BN)."""
    c = gamma.shape[0]
    s = psum.reshape(-1, c).sum(axis=0)
    q = psq.reshape(-1, c).sum(axis=0)
    mean = s / count
    var = q / count - mean * mean            # biased variance, single pass
    scale = gamma * lax.rsqrt(var + EPS)
    shift = beta - mean * scale
    return scale.reshape(1, c), shift.reshape(1, c)


def _row_tile(rows):
    if rows % 16 == 0:
        return max(8, min(1024, rows // 2))  # >= 2 lane-dense, 8-aligned row tiles
    return rows


def _bn_act(z_slab, scale, shift, res=None, out_dtype=jnp.float32):
    """Row-tiled affine (+ residual) + ReLU over the lane-dense (rows, 128) slab."""
    rows, lanes = z_slab.shape
    tile = _row_tile(rows)
    grid = (pl.cdiv(rows, tile),)
    row_spec = pl.BlockSpec((tile, lanes), lambda i: (i, 0))
    vec_spec = pl.BlockSpec(scale.shape, lambda i: (0, 0))
    out_shape = jax.ShapeDtypeStruct((rows, lanes), out_dtype)
    if res is None:
        return pl.pallas_call(
            _bn_relu_kernel, grid=grid,
            in_specs=[row_spec, vec_spec, vec_spec], out_specs=row_spec,
            out_shape=out_shape, compiler_params=_cparams(1),
        )(z_slab, scale, shift)
    return pl.pallas_call(
        _bn_res_relu_kernel, grid=grid,
        in_specs=[row_spec, row_spec, vec_spec, vec_spec], out_specs=row_spec,
        out_shape=out_shape, compiler_params=_cparams(1),
    )(z_slab, res, scale, shift)


# ---------------------------------------------------------------------------
# Forward pass
# ---------------------------------------------------------------------------
@functools.partial(jax.jit, static_argnames=("compute_dtype",))
def residual_block_forward(x, conv_w, conv_b, bn_gamma, bn_beta,
                           compute_dtype=jnp.bfloat16):
    """Exact forward of Residual_Block (module in its default training mode)."""
    del conv_b  # exact no-op: training-mode BN subtracts the batch mean -> bias cancels
    n, c, h, w = x.shape
    assert 128 % c == 0 and (h * w * c) % FOLD == 0, (
        "lane-dense fold needs C | 128 and 128 | H*W*C")
    rows = n * h * w * c // FOLD
    count = n * h * w

    xt = jnp.transpose(x, (0, 2, 3, 1))                 # NHWC (only transpose on entry)
    x_res = xt.reshape(rows, FOLD)                      # residual slab, f32 (free view)
    w9 = jnp.transpose(conv_w, (2, 3, 1, 0)).reshape(9 * c, c).astype(compute_dtype)

    # x2 = relu(bn(conv(x)))
    z1, s1, q1 = _conv_stats(xt.astype(compute_dtype), w9, compute_dtype)
    sc1, sh1 = _bn_affine(s1, q1, bn_gamma, bn_beta, count)
    y1 = _bn_act(z1.reshape(rows, FOLD), sc1, sh1, res=None, out_dtype=compute_dtype)

    # out = relu(bn(conv(x2)) + x)    (same conv / BN parameters reused)
    z2, s2, q2 = _conv_stats(y1.reshape(n, h, w, c), w9, compute_dtype)
    sc2, sh2 = _bn_affine(s2, q2, bn_gamma, bn_beta, count)
    out_slab = _bn_act(z2.reshape(rows, FOLD), sc2, sh2, res=x_res,
                       out_dtype=jnp.float32)

    return jnp.transpose(out_slab.reshape(n, h, w, c), (0, 3, 1, 2))    # back to NCHW


# ---------------------------------------------------------------------------
# Pure-JAX f32 reference (mirrors the PyTorch training-mode forward)
# ---------------------------------------------------------------------------
def _reference_forward(x, conv_w, conv_b, bn_gamma, bn_beta):
    def conv_bn(y):
        z = lax.conv_general_dilated(
            y, conv_w, (1, 1), 'SAME',
            dimension_numbers=('NCHW', 'OIHW', 'NCHW'),
            precision=lax.Precision.HIGHEST)
        z = z + conv_b[None, :, None, None]
        mean = jnp.mean(z, axis=(0, 2, 3), keepdims=True)
        var = jnp.mean((z - mean) ** 2, axis=(0, 2, 3), keepdims=True)
        zh = (z - mean) * lax.rsqrt(var + EPS)
        return zh * bn_gamma[None, :, None, None] + bn_beta[None, :, None, None]

    x2 = jnp.maximum(conv_bn(x), 0.0)
    return jnp.maximum(conv_bn(x2) + x, 0.0)


if __name__ == "__main__":
    key = jax.random.PRNGKey(0)
    k_x, k_w, k_b = jax.random.split(key, 3)

    N, C, H, W = 2, 4, 16, 16
    x = jax.random.normal(k_x, (N, C, H, W), dtype=jnp.float32)

    # Shapes/init match nn.Conv2d(C, C, 3, padding=1) and nn.BatchNorm2d(C) defaults.
    fan_in = C * 3 * 3
    bound = 1.0 / (fan_in ** 0.5)
    conv_w = jax.random.uniform(k_w, (C, C, 3, 3), jnp.float32, -bound, bound)
    conv_b = jax.random.uniform(k_b, (C,), jnp.float32, -bound, bound)
    bn_gamma = jnp.ones((C,), jnp.float32)
    bn_beta = jnp.zeros((C,), jnp.float32)

    out = residual_block_forward(x, conv_w, conv_b, bn_gamma, bn_beta)
    out = jax.block_until_ready(out)
    ref = _reference_forward(x, conv_w, conv_b, bn_gamma, bn_beta)

    assert out.shape == (N, C, H, W)

    # Structural check: any wrong tap / weight mapping / per-channel scale bug is O(1)
    # off globally; the measured bf16-path global error is ~1e-2.
    rel_fro = float(jnp.linalg.norm(out - ref) / jnp.linalg.norm(ref))
    assert rel_fro < 4e-2, f"relative Frobenius error too large: {rel_fro}"

    # Elementwise check: bf16 MXU inputs + bf16 z storage amplified by two
    # training-mode BN normalisations (each divides by the batch std) bound the
    # worst element at a few 1e-2; structural bugs would blow far past this.
    max_err = float(jnp.max(jnp.abs(out - ref)))
    assert jnp.allclose(out, ref, atol=8e-2, rtol=8e-2), (
        f"mismatch vs reference (max abs err {max_err}, rel fro {rel_fro})")

    print("KERNEL_OK")
</pallas_src>

<mosaic_0001>
module attributes {stable_mosaic.version = 11 : i64} {
  func.func @_conv_stats_kernel(%arg0: i32, %arg1: memref<1x16x16x4xbf16, #tpu.memory_space<vmem>>, %arg2: memref<36x4xbf16, #tpu.memory_space<vmem>>, %arg3: memref<1x256x4xbf16, #tpu.memory_space<vmem>>, %arg4: memref<1x1x4xf32, #tpu.memory_space<vmem>>, %arg5: memref<1x1x4xf32, #tpu.memory_space<vmem>>) attributes {dimension_semantics = [#tpu.dimension_semantics<parallel>], iteration_bounds = array<i64: 2>, scalar_prefetch = 0 : i64, scratch_operands = 0 : i64, tpu.core_type = #tpu.core_type<tc>, window_params = [{transform_indices = @transform_0, window_bounds = array<i64: 1, 16, 16, 4>}, {pipeline_mode = #tpu.pipeline_mode<synchronous>, transform_indices = @transform_1, window_bounds = array<i64: 36, 4>}, {transform_indices = @transform_2, window_bounds = array<i64: 1, 256, 4>}, {transform_indices = @transform_3, window_bounds = array<i64: 1, 1, 4>}, {transform_indices = @transform_4, window_bounds = array<i64: 1, 1, 4>}]} {
    %c0 = arith.constant 0 : index
    %c0_0 = arith.constant 0 : index
    %c0_1 = arith.constant 0 : index
    %c0_2 = arith.constant 0 : index
    %0 = vector.load %arg1[%c0, %c0_0, %c0_1, %c0_2] : memref<1x16x16x4xbf16, #tpu.memory_space<vmem>>, vector<1x16x16x4xbf16>
    %1 = vector.shape_cast %0 : vector<1x16x16x4xbf16> to vector<16x16x4xbf16>
    %cst = arith.constant 0.000000e+00 : bf16
    %2 = vector.broadcast %cst : bf16 to vector<16x1x4xbf16>
    %cst_3 = arith.constant 0.000000e+00 : bf16
    %3 = vector.broadcast %cst_3 : bf16 to vector<1x18x4xbf16>
    %4 = tpu.concatenate %2, %1, %2 in 1 : vector<16x1x4xbf16>, vector<16x16x4xbf16>, vector<16x1x4xbf16> -> vector<16x18x4xbf16>
    %5 = tpu.concatenate %3, %4, %3 in 0 : vector<1x18x4xbf16>, vector<16x18x4xbf16>, vector<1x18x4xbf16> -> vector<18x18x4xbf16>
    %6 = vector.extract_strided_slice %5 {offsets = [0, 0, 0], sizes = [16, 16, 4], strides = [1, 1, 1]} : vector<18x18x4xbf16> to vector<16x16x4xbf16>
    %7 = vector.extract_strided_slice %5 {offsets = [0, 1, 0], sizes = [16, 16, 4], strides = [1, 1, 1]} : vector<18x18x4xbf16> to vector<16x16x4xbf16>
    %8 = vector.extract_strided_slice %5 {offsets = [0, 2, 0], sizes = [16, 16, 4], strides = [1, 1, 1]} : vector<18x18x4xbf16> to vector<16x16x4xbf16>
    %9 = vector.extract_strided_slice %5 {offsets = [1, 0, 0], sizes = [16, 16, 4], strides = [1, 1, 1]} : vector<18x18x4xbf16> to vector<16x16x4xbf16>
    %10 = vector.extract_strided_slice %5 {offsets = [1, 1, 0], sizes = [16, 16, 4], strides = [1, 1, 1]} : vector<18x18x4xbf16> to vector<16x16x4xbf16>
    %11 = vector.extract_strided_slice %5 {offsets = [1, 2, 0], sizes = [16, 16, 4], strides = [1, 1, 1]} : vector<18x18x4xbf16> to vector<16x16x4xbf16>
    %12 = vector.extract_strided_slice %5 {offsets = [2, 0, 0], sizes = [16, 16, 4], strides = [1, 1, 1]} : vector<18x18x4xbf16> to vector<16x16x4xbf16>
    %13 = vector.extract_strided_slice %5 {offsets = [2, 1, 0], sizes = [16, 16, 4], strides = [1, 1, 1]} : vector<18x18x4xbf16> to vector<16x16x4xbf16>
    %14 = vector.extract_strided_slice %5 {offsets = [2, 2, 0], sizes = [16, 16, 4], strides = [1, 1, 1]} : vector<18x18x4xbf16> to vector<16x16x4xbf16>
    %15 = tpu.concatenate %6, %7, %8, %9, %10, %11, %12, %13, %14 in 2 : vector<16x16x4xbf16>, vector<16x16x4xbf16>, vector<16x16x4xbf16>, vector<16x16x4xbf16>, vector<16x16x4xbf16>, vector<16x16x4xbf16>, vector<16x16x4xbf16>, vector<16x16x4xbf16>, vector<16x16x4xbf16> -> vector<16x16x36xbf16>
    %16 = vector.shape_cast %15 : vector<16x16x36xbf16> to vector<256x36xbf16>
    %c0_4 = arith.constant 0 : index
    %c0_5 = arith.constant 0 : index
    %17 = vector.load %arg2[%c0_4, %c0_5] : memref<36x4xbf16, #tpu.memory_space<vmem>>, vector<36x4xbf16>
    %cst_6 = arith.constant dense<0.000000e+00> : vector<256x4xf32>
    %18 = tpu.matmul %16, %17, %cst_6 {dimension_numbers = #tpu.dot_dimension_numbers<[1], [0], [0], [1], [0, 0, 1, 1], [], []>} : vector<256x36xbf16>, vector<36x4xbf16>, vector<256x4xf32> -> vector<256x4xf32>
    %19 = vector.shape_cast %18 : vector<256x4xf32> to vector<1x256x4xf32>
    %20 = arith.truncf %19 : vector<1x256x4xf32> to vector<1x256x4xbf16>
    %c0_7 = arith.constant 0 : index
    %c0_8 = arith.constant 0 : index
    %c0_9 = arith.constant 0 : index
    %21 = vector.load %arg3[%c0_7, %c0_8, %c0_9] : memref<1x256x4xbf16, #tpu.memory_space<vmem>>, vector<1x256x4xbf16>
    tpu.vector_store %arg3[%c0_7, %c0_8, %c0_9], %20 {strides = array<i32>} : memref<1x256x4xbf16, #tpu.memory_space<vmem>>, vector<1x256x4xbf16>,
    %cst_10 = arith.constant dense<0.000000e+00> : vector<4xf32>
    %22 = vector.multi_reduction <add>, %18, %cst_10 [0] : vector<256x4xf32> to vector<4xf32>
    %23 = vector.shape_cast %22 : vector<4xf32> to vector<1x4xf32>
    %c0_11 = arith.constant 0 : index
    %c0_12 = arith.constant 0 : index
    %c0_13 = arith.constant 0 : index
    %24 = vector.load %arg4[%c0_11, %c0_12, %c0_13] : memref<1x1x4xf32, #tpu.memory_space<vmem>>, vector<1x1x4xf32>
    %25 = vector.shape_cast %24 : vector<1x1x4xf32> to vector<1x4xf32>
    %26 = vector.shape_cast %23 : vector<1x4xf32> to vector<1x1x4xf32>
    tpu.vector_store %arg4[%c0_11, %c0_12, %c0_13], %26 {strides = array<i32>} : memref<1x1x4xf32, #tpu.memory_space<vmem>>, vector<1x1x4xf32>,
    %27 = arith.mulf %18, %18 : vector<256x4xf32>
    %cst_14 = arith.constant dense<0.000000e+00> : vector<4xf32>
    %28 = vector.multi_reduction <add>, %27, %cst_14 [0] : vector<256x4xf32> to vector<4xf32>
    %29 = vector.shape_cast %28 : vector<4xf32> to vector<1x4xf32>
    %c0_15 = arith.constant 0 : index
    %c0_16 = arith.constant 0 : index
    %c0_17 = arith.constant 0 : index
    %30 = vector.load %arg5[%c0_15, %c0_16, %c0_17] : memref<1x1x4xf32, #tpu.memory_space<vmem>>, vector<1x1x4xf32>
    %31 = vector.shape_cast %30 : vector<1x1x4xf32> to vector<1x4xf32>
    %32 = vector.shape_cast %29 : vector<1x4xf32> to vector<1x1x4xf32>
    tpu.vector_store %arg5[%c0_15, %c0_16, %c0_17], %32 {strides = array<i32>} : memref<1x1x4xf32, #tpu.memory_space<vmem>>, vector<1x1x4xf32>,
    return
  }
  func.func @transform_0(%arg0: i32) -> (i32, i32, i32, i32) {
    %c0_i32 = arith.constant 0 : i32
    %c0_i32_0 = arith.constant 0 : i32
    %c0_i32_1 = arith.constant 0 : i32
    %c0_i32_2 = arith.constant 0 : i32
    return %arg0, %c0_i32, %c0_i32_0, %c0_i32_1 : i32, i32, i32, i32
  }
  func.func @transform_1(%arg0: i32) -> (i32, i32) {
    %c0_i32 = arith.constant 0 : i32
    %c0_i32_0 = arith.constant 0 : i32
    %c0_i32_1 = arith.constant 0 : i32
    return %c0_i32, %c0_i32_0 : i32, i32
  }
  func.func @transform_2(%arg0: i32) -> (i32, i32, i32) {
    %c0_i32 = arith.constant 0 : i32
    %c0_i32_0 = arith.constant 0 : i32
    %c0_i32_1 = arith.constant 0 : i32
    return %arg0, %c0_i32, %c0_i32_0 : i32, i32, i32
  }
  func.func @transform_3(%arg0: i32) -> (i32, i32, i32) {
    %c0_i32 = arith.constant 0 : i32
    %c0_i32_0 = arith.constant 0 : i32
    %c0_i32_1 = arith.constant 0 : i32
    return %arg0, %c0_i32, %c0_i32_0 : i32, i32, i32
  }
  func.func @transform_4(%arg0: i32) -> (i32, i32, i32) {
    %c0_i32 = arith.constant 0 : i32
    %c0_i32_0 = arith.constant 0 : i32
    %c0_i32_1 = arith.constant 0 : i32
    return %arg0, %c0_i32, %c0_i32_0 : i32, i32, i32
  }
}

module attributes {stable_mosaic.version = 11 : i64} {
  func.func @_bn_relu_kernel(%arg0: i32, %arg1: memref<8x128xbf16, #tpu.memory_space<vmem>>, %arg2: memref<1x4xf32, #tpu.memory_space<vmem>>, %arg3: memref<1x4xf32, #tpu.memory_space<vmem>>, %arg4: memref<8x128xbf16, #tpu.memory_space<vmem>>) attributes {dimension_semantics = [#tpu.dimension_semantics<parallel>], iteration_bounds = array<i64: 2>, scalar_prefetch = 0 : i64, scratch_operands = 0 : i64, tpu.core_type = #tpu.core_type<tc>, window_params = [{transform_indices = @transform_0, window_bounds = array<i64: 8, 128>}, {pipeline_mode = #tpu.pipeline_mode<synchronous>, transform_indices = @transform_1, window_bounds = array<i64: 1, 4>}, {pipeline_mode = #tpu.pipeline_mode<synchronous>, transform_indices = @transform_2, window_bounds = array<i64: 1, 4>}, {transform_indices = @transform_3, window_bounds = array<i64: 8, 128>}]} {
    %c0 = arith.constant 0 : index
    %c0_0 = arith.constant 0 : index
    %0 = vector.load %arg2[%c0, %c0_0] : memref<1x4xf32, #tpu.memory_space<vmem>>, vector<1x4xf32>
    %1 = tpu.concatenate %0, %0 in 1 : vector<1x4xf32>, vector<1x4xf32> -> vector<1x8xf32>
    %2 = tpu.concatenate %1, %1 in 1 : vector<1x8xf32>, vector<1x8xf32> -> vector<1x16xf32>
    %3 = tpu.concatenate %2, %2 in 1 : vector<1x16xf32>, vector<1x16xf32> -> vector<1x32xf32>
    %4 = tpu.concatenate %3, %3 in 1 : vector<1x32xf32>, vector<1x32xf32> -> vector<1x64xf32>
    %5 = tpu.concatenate %4, %4 in 1 : vector<1x64xf32>, vector<1x64xf32> -> vector<1x128xf32>
    %c0_1 = arith.constant 0 : index
    %c0_2 = arith.constant 0 : index
    %6 = vector.load %arg3[%c0_1, %c0_2] : memref<1x4xf32, #tpu.memory_space<vmem>>, vector<1x4xf32>
    %7 = tpu.concatenate %6, %6 in 1 : vector<1x4xf32>, vector<1x4xf32> -> vector<1x8xf32>
    %8 = tpu.concatenate %7, %7 in 1 : vector<1x8xf32>, vector<1x8xf32> -> vector<1x16xf32>
    %9 = tpu.concatenate %8, %8 in 1 : vector<1x16xf32>, vector<1x16xf32> -> vector<1x32xf32>
    %10 = tpu.concatenate %9, %9 in 1 : vector<1x32xf32>, vector<1x32xf32> -> vector<1x64xf32>
    %11 = tpu.concatenate %10, %10 in 1 : vector<1x64xf32>, vector<1x64xf32> -> vector<1x128xf32>
    %c0_3 = arith.constant 0 : index
    %c0_4 = arith.constant 0 : index
    %12 = vector.load %arg1[%c0_3, %c0_4] : memref<8x128xbf16, #tpu.memory_space<vmem>>, vector<8x128xbf16>
    %13 = arith.extf %12 : vector<8x128xbf16> to vector<8x128xf32>
    %14 = vector.broadcast %5 : vector<1x128xf32> to vector<8x128xf32>
    %15 = arith.mulf %13, %14 : vector<8x128xf32>
    %16 = vector.broadcast %11 : vector<1x128xf32> to vector<8x128xf32>
    %17 = arith.addf %15, %16 : vector<8x128xf32>
    %cst = arith.constant 0.000000e+00 : f32
    %18 = vector.broadcast %cst : f32 to vector<8x128xf32>
    %19 = arith.maximumf %17, %18 : vector<8x128xf32>
    %20 = arith.truncf %19 : vector<8x128xf32> to vector<8x128xbf16>
    %c0_5 = arith.constant 0 : index
    %c0_6 = arith.constant 0 : index
    %21 = vector.load %arg4[%c0_5, %c0_6] : memref<8x128xbf16, #tpu.memory_space<vmem>>, vector<8x128xbf16>
    tpu.vector_store %arg4[%c0_5, %c0_6], %20 {strides = array<i32>} : memref<8x128xbf16, #tpu.memory_space<vmem>>, vector<8x128xbf16>,
    return
  }
  func.func @transform_0(%arg0: i32) -> (i32, i32) {
    %c0_i32 = arith.constant 0 : i32
    %c0_i32_0 = arith.constant 0 : i32
    return %arg0, %c0_i32 : i32, i32
  }
  func.func @transform_1(%arg0: i32) -> (i32, i32) {
    %c0_i32 = arith.constant 0 : i32
    %c0_i32_0 = arith.constant 0 : i32
    %c0_i32_1 = arith.constant 0 : i32
    return %c0_i32, %c0_i32_0 : i32, i32
  }
  func.func @transform_2(%arg0: i32) -> (i32, i32) {
    %c0_i32 = arith.constant 0 : i32
    %c0_i32_0 = arith.constant 0 : i32
    %c0_i32_1 = arith.constant 0 : i32
    return %c0_i32, %c0_i32_0 : i32, i32
  }
  func.func @transform_3(%arg0: i32) -> (i32, i32) {
    %c0_i32 = arith.constant 0 : i32
    %c0_i32_0 = arith.constant 0 : i32
    return %arg0, %c0_i32 : i32, i32
  }
}

module attributes {stable_mosaic.version = 11 : i64} {
  func.func @_bn_res_relu_kernel(%arg0: i32, %arg1: memref<8x128xbf16, #tpu.memory_space<vmem>>, %arg2: memref<8x128xf32, #tpu.memory_space<vmem>>, %arg3: memref<1x4xf32, #tpu.memory_space<vmem>>, %arg4: memref<1x4xf32, #tpu.memory_space<vmem>>, %arg5: memref<8x128xf32, #tpu.memory_space<vmem>>) attributes {dimension_semantics = [#tpu.dimension_semantics<parallel>], iteration_bounds = array<i64: 2>, scalar_prefetch = 0 : i64, scratch_operands = 0 : i64, tpu.core_type = #tpu.core_type<tc>, window_params = [{transform_indices = @transform_0, window_bounds = array<i64: 8, 128>}, {transform_indices = @transform_1, window_bounds = array<i64: 8, 128>}, {pipeline_mode = #tpu.pipeline_mode<synchronous>, transform_indices = @transform_2, window_bounds = array<i64: 1, 4>}, {pipeline_mode = #tpu.pipeline_mode<synchronous>, transform_indices = @transform_3, window_bounds = array<i64: 1, 4>}, {transform_indices = @transform_4, window_bounds = array<i64: 8, 128>}]} {
    %c0 = arith.constant 0 : index
    %c0_0 = arith.constant 0 : index
    %0 = vector.load %arg3[%c0, %c0_0] : memref<1x4xf32, #tpu.memory_space<vmem>>, vector<1x4xf32>
    %1 = tpu.concatenate %0, %0 in 1 : vector<1x4xf32>, vector<1x4xf32> -> vector<1x8xf32>
    %2 = tpu.concatenate %1, %1 in 1 : vector<1x8xf32>, vector<1x8xf32> -> vector<1x16xf32>
    %3 = tpu.concatenate %2, %2 in 1 : vector<1x16xf32>, vector<1x16xf32> -> vector<1x32xf32>
    %4 = tpu.concatenate %3, %3 in 1 : vector<1x32xf32>, vector<1x32xf32> -> vector<1x64xf32>
    %5 = tpu.concatenate %4, %4 in 1 : vector<1x64xf32>, vector<1x64xf32> -> vector<1x128xf32>
    %c0_1 = arith.constant 0 : index
    %c0_2 = arith.constant 0 : index
    %6 = vector.load %arg4[%c0_1, %c0_2] : memref<1x4xf32, #tpu.memory_space<vmem>>, vector<1x4xf32>
    %7 = tpu.concatenate %6, %6 in 1 : vector<1x4xf32>, vector<1x4xf32> -> vector<1x8xf32>
    %8 = tpu.concatenate %7, %7 in 1 : vector<1x8xf32>, vector<1x8xf32> -> vector<1x16xf32>
    %9 = tpu.concatenate %8, %8 in 1 : vector<1x16xf32>, vector<1x16xf32> -> vector<1x32xf32>
    %10 = tpu.concatenate %9, %9 in 1 : vector<1x32xf32>, vector<1x32xf32> -> vector<1x64xf32>
    %11 = tpu.concatenate %10, %10 in 1 : vector<1x64xf32>, vector<1x64xf32> -> vector<1x128xf32>
    %c0_3 = arith.constant 0 : index
    %c0_4 = arith.constant 0 : index
    %12 = vector.load %arg1[%c0_3, %c0_4] : memref<8x128xbf16, #tpu.memory_space<vmem>>, vector<8x128xbf16>
    %13 = arith.extf %12 : vector<8x128xbf16> to vector<8x128xf32>
    %14 = vector.broadcast %5 : vector<1x128xf32> to vector<8x128xf32>
    %15 = arith.mulf %13, %14 : vector<8x128xf32>
    %16 = vector.broadcast %11 : vector<1x128xf32> to vector<8x128xf32>
    %17 = arith.addf %15, %16 : vector<8x128xf32>
    %c0_5 = arith.constant 0 : index
    %c0_6 = arith.constant 0 : index
    %18 = vector.load %arg2[%c0_5, %c0_6] : memref<8x128xf32, #tpu.memory_space<vmem>>, vector<8x128xf32>
    %19 = arith.addf %17, %18 : vector<8x128xf32>
    %cst = arith.constant 0.000000e+00 : f32
    %20 = vector.broadcast %cst : f32 to vector<8x128xf32>
    %21 = arith.maximumf %19, %20 : vector<8x128xf32>
    %c0_7 = arith.constant 0 : index
    %c0_8 = arith.constant 0 : index
    %22 = vector.load %arg5[%c0_7, %c0_8] : memref<8x128xf32, #tpu.memory_space<vmem>>, vector<8x128xf32>
    tpu.vector_store %arg5[%c0_7, %c0_8], %21 {strides = array<i32>} : memref<8x128xf32, #tpu.memory_space<vmem>>, vector<8x128xf32>,
    return
  }
  func.func @transform_0(%arg0: i32) -> (i32, i32) {
    %c0_i32 = arith.constant 0 : i32
    %c0_i32_0 = arith.constant 0 : i32
    return %arg0, %c0_i32 : i32, i32
  }
  func.func @transform_1(%arg0: i32) -> (i32, i32) {
    %c0_i32 = arith.constant 0 : i32
    %c0_i32_0 = arith.constant 0 : i32
    return %arg0, %c0_i32 : i32, i32
  }
  func.func @transform_2(%arg0: i32) -> (i32, i32) {
    %c0_i32 = arith.constant 0 : i32
    %c0_i32_0 = arith.constant 0 : i32
    %c0_i32_1 = arith.constant 0 : i32
    return %c0_i32, %c0_i32_0 : i32, i32
  }
  func.func @transform_3(%arg0: i32) -> (i32, i32) {
    %c0_i32 = arith.constant 0 : i32
    %c0_i32_0 = arith.constant 0 : i32
    %c0_i32_1 = arith.constant 0 : i32
    return %c0_i32, %c0_i32_0 : i32, i32
  }
  func.func @transform_4(%arg0: i32) -> (i32, i32) {
    %c0_i32 = arith.constant 0 : i32
    %c0_i32_0 = arith.constant 0 : i32
    return %arg0, %c0_i32 : i32, i32
  }
}

</mosaic_0001>

<bundles_post_ra>
// kernel: residual_block_forward.5
= control target key start
LH: loop header
LB: loop body
LE: loop exit
PB: predicated region body
PF: predicated region fallthrough
CT: control target
= control target key end

     0   :  { %s344_s12 = smov 0   ;;  %s377_s0 = inlined_call_operand.vmem [shape: bf16[16,128], index: 0, kind: input, shape index: {}]   ;;  %s378_s1 = inlined_call_operand.vmem [shape: f32[1,4], index: 1, kind: input, shape index: {}]   ;;  %s379_s2 = inlined_call_operand.vmem [shape: f32[1,4], index: 2, kind: input, shape index: {}]   ;;  %s380_s3 = inlined_call_operand.vmem [shape: bf16[16,128], index: 3, kind: output, shape index: {}]  }
   0x1 LB: > { %s287_s13 = sadd.s32 4294967295, %s317_s12   ;;  %p291_p0 = scmp.ge.s32.totalorder %s317_s12, 1  ;;  %s317_s12 = sphi %s344_s12, %s13_s12  }
   0x2   : > { %p136_p1 = scmp.lt.s32.totalorder %s317_s12, 3 }
   0x4   : > { %p137_p2 = pnand %p291_p0, %p136_p1 }
   0x5   : > { %s319_s16 = smov (!%p137_p2), 4   ;;  %s320_s21 = smov (!%p137_p2), 8  }
   0x6   : > { %140 = sbr.rel (%p137_p2) target bundleno = 585 (0x249), region = 32  ;;  %s321_s24 = smov (!%p137_p2), 16  }
   0x7   : > { %s322_s25 = smov (!%p137_p2), 32   ;;  %s323_s26 = smov (!%p137_p2), 64  }
   0x8   : > { %p158_p3 = scmp.lt.s32.totalorder (!%p137_p2), %s287_s13, 1 }
   0xb   : > { %v309_v0 = vld [vmem:[%s378_s1] ss:$0 sm:$0xff]  ;;  %vm172_vm0 = vcmask 31744   ;;  %vm178_vm1 = vcmask 64512   ;;  %vm184_vm2 = vcmask 130048   ;;  %vm190_vm3 = vcmask 261120  }
   0xc   : > { %169 = vrot.lane.b32.xlu0 %v309_v0, %s319_s16  ;;  %v310_v1 = vld [vmem:[%s379_s2] ss:$0 sm:$0xff]  ;;  %s382_s13 = smov (!%p158_p3, %s287_s13), 1  ;;  %vm196_vm4 = vcmask 523264  }
   0xd   : > { %v166_v2 = vld [vmem:[%s378_s1] sm:$0x1]  ;;  %s292_s27 = sshll.u32 %s382_s13, 2 }
   0xe   : > { %v198_v5 = vld [vmem:[%s379_s2] sm:$0x1]  ;;  %s161_s30 = scalar_lea.vmem %s377_s0, %s292_s27  ;;  %s165_s6 = scalar_lea.vmem %s380_s3, %s292_s27 }
   0xf   : > { %v225_v22 = vld [vmem:[%s161_s30] sm:$0xf] }
  0x10   : > { %v226_v23 = vunpack.c.l.bf16 %v225_v22 }
  0x14   : > { %201 = vrot.lane.b32.xlu0 %v310_v1, %s319_s16 }
  0x7e   : > { %v170_v3 = vpop.permute.xlu0 %169 }
  0x7f   : > { %v173_v4 = vsel %vm172_vm0, %v166_v2, %v170_v3 }
  0x80   : > { %175 = vrot.lane.b32.xlu1 %v173_v4, %s320_s21 }
  0x86   : > { %v202_v6 = vpop.permute.xlu0 %201 }
  0x87   : > { %v204_v7 = vsel %vm172_vm0, %v198_v5, %v202_v6 }
  0x88   : > { %206 = vrot.lane.b32.xlu1 %v204_v7, %s320_s21 }
  0xf2   : > { %v176_v8 = vpop.permute.xlu1 %175 }
  0xf3   : > { %v179_v9 = vsel %vm178_vm1, %v173_v4, %v176_v8 }
  0xf4   : > { %181 = vrot.lane.b32.xlu2 %v179_v9, %s321_s24 }
  0xfa   : > { %v207_v10 = vpop.permute.xlu1 %206 }
  0xfb   : > { %v209_v11 = vsel %vm178_vm1, %v204_v7, %v207_v10 }
  0xfc   : > { %211 = vrot.lane.b32.xlu2 %v209_v11, %s321_s24 }
 0x14e   : > { %v182_v12 = vpop.permute.xlu2 %181 }
 0x14f   : > { %v185_v13 = vsel %vm184_vm2, %v179_v9, %v182_v12 }
 0x150   : > { %187 = vrot.lane.b32.xlu0 %v185_v13, %s322_s25 }
 0x156   : > { %v212_v14 = vpop.permute.xlu2 %211 }
 0x157   : > { %v214_v15 = vsel %vm184_vm2, %v209_v11, %v212_v14 }
 0x158   : > { %216 = vrot.lane.b32.xlu1 %v214_v15, %s322_s25 }
 0x1c2   : > { %v188_v16 = vpop.permute.xlu0 %187 }
 0x1c3   : > { %v191_v17 = vsel %vm190_vm3, %v185_v13, %v188_v16 }
 0x1c4   : > { %193 = vrot.lane.b32.xlu2 %v191_v17, %s323_s26 }
 0x1ca   : > { %v217_v18 = vpop.permute.xlu1 %216 }
 0x1cb   : > { %v219_v19 = vsel %vm190_vm3, %v214_v15, %v217_v18 }
 0x1cc   : > { %221 = vrot.lane.b32.xlu0 %v219_v19, %s323_s26 }
 0x21e   : > { %v194_v20 = vpop.permute.xlu2 %193 }
 0x21f   : > { %v197_v21 = vsel %vm196_vm4, %v191_v17, %v194_v20 }
 0x220   : > { %v227_v24 = vperm.slane %v197_v21, 0 }
 0x222   : > { %v228_v27 = vmul.f32 %v227_v24, %v226_v23 }
 0x23e   : > { %v222_v25 = vpop.permute.xlu0 %221 }
 0x23f   : > { %v224_v26 = vsel %vm196_vm4, %v219_v19, %v222_v25 }
 0x240   : > { %v229_v28 = vperm.slane %v224_v26, 0 }
 0x242   : > { %v230_v29 = vadd.f32 %v229_v28, %v228_v27 }
 0x244   : > { %v231_v30 = vmax.f32 %v230_v29, 0.0 }
 0x246   : > { %v232_v31 = vpack.c.bf16 %v231_v30, %v231_v30 }
 0x248   : > { %233 = vst [vmem:[%s165_s6] sm:$0xf] %v232_v31 }
 0x249 PF: > { %s13_s12 = sadd.s32 1, %s317_s12  }
 0x24a   : > { %p10_p4 = scmp.ge.s32.totalorder %s13_s12, 4  }
 0x24c   :  { %12 = sbr.rel (!%p10_p4) target bundleno = 1 (0x1), region = 62 }

// kernel: residual_block_forward.7
= control target key start
LH: loop header
LB: loop body
LE: loop exit
PB: predicated region body
PF: predicated region fallthrough
CT: control target
= control target key end

     0   :  { %s407_s15 = smov 0   ;;  %s443_s0 = inlined_call_operand.vmem [shape: bf16[16,128], index: 0, kind: input, shape index: {}]   ;;  %s444_s1 = inlined_call_operand.vmem [shape: f32[16,128], index: 1, kind: input, shape index: {}]   ;;  %s445_s2 = inlined_call_operand.vmem [shape: f32[1,4], index: 2, kind: input, shape index: {}]   ;;  %s446_s3 = inlined_call_operand.vmem [shape: f32[1,4], index: 3, kind: input, shape index: {}]   ;;  %s447_s4 = inlined_call_operand.vmem [shape: f32[16,128], index: 4, kind: output, shape index: {}]  }
   0x1 LB: > { %s344_s16 = sadd.s32 4294967295, %s375_s15   ;;  %p348_p0 = scmp.ge.s32.totalorder %s375_s15, 1  ;;  %s375_s15 = sphi %s407_s15, %s14_s15  }
   0x2   : > { %p170_p1 = scmp.lt.s32.totalorder %s375_s15, 3 }
   0x4   : > { %p171_p2 = pnand %p348_p0, %p170_p1 }
   0x5   : > { %s377_s19 = smov (!%p171_p2), 4   ;;  %s378_s24 = smov (!%p171_p2), 8  }
   0x6   : > { %174 = sbr.rel (%p171_p2) target bundleno = 585 (0x249), region = 36  ;;  %s379_s27 = smov (!%p171_p2), 16  }
   0x7   : > { %s380_s28 = smov (!%p171_p2), 32   ;;  %s381_s29 = smov (!%p171_p2), 64  }
   0x8   : > { %p198_p3 = scmp.lt.s32.totalorder (!%p171_p2), %s344_s16, 1 }
   0xb   : > { %v367_v0 = vld [vmem:[%s445_s2] ss:$0 sm:$0xff]  ;;  %vm216_vm0 = vcmask 31744   ;;  %vm222_vm1 = vcmask 64512   ;;  %vm228_vm2 = vcmask 130048   ;;  %vm234_vm3 = vcmask 261120  }
   0xc   : > { %213 = vrot.lane.b32.xlu0 %v367_v0, %s377_s19  ;;  %v368_v1 = vld [vmem:[%s446_s3] ss:$0 sm:$0xff]  ;;  %s449_s16 = smov (!%p198_p3, %s344_s16), 1  ;;  %vm240_vm4 = vcmask 523264  }
   0xd   : > { %v210_v2 = vld [vmem:[%s445_s2] sm:$0x1]  ;;  %s349_s30 = sshll.u32 %s449_s16, 2  ;;  %s350_s8 = sshll.u32 %s449_s16, 3 }
   0xe   : > { %v242_v5 = vld [vmem:[%s446_s3] sm:$0x1]  ;;  %s201_s7 = scalar_lea.vmem %s443_s0, %s349_s30  ;;  %s205_s11 = scalar_lea.vmem %s444_s1, %s350_s8 }
   0xf   : > { %v269_v22 = vld [vmem:[%s201_s7] sm:$0xf]  ;;  %s209_s14 = scalar_lea.vmem %s447_s4, %s350_s8 }
  0x10   : > { %v270_v23 = vunpack.c.l.bf16 %v269_v22  ;;  %v275_v29 = vld [vmem:[%s205_s11] sm:$0xff] }
  0x14   : > { %245 = vrot.lane.b32.xlu0 %v368_v1, %s377_s19 }
  0x7e   : > { %v214_v3 = vpop.permute.xlu0 %213 }
  0x7f   : > { %v217_v4 = vsel %vm216_vm0, %v210_v2, %v214_v3 }
  0x80   : > { %219 = vrot.lane.b32.xlu1 %v217_v4, %s378_s24 }
  0x86   : > { %v246_v6 = vpop.permute.xlu0 %245 }
  0x87   : > { %v248_v7 = vsel %vm216_vm0, %v242_v5, %v246_v6 }
  0x88   : > { %250 = vrot.lane.b32.xlu1 %v248_v7, %s378_s24 }
  0xf2   : > { %v220_v8 = vpop.permute.xlu1 %219 }
  0xf3   : > { %v223_v9 = vsel %vm222_vm1, %v217_v4, %v220_v8 }
  0xf4   : > { %225 = vrot.lane.b32.xlu2 %v223_v9, %s379_s27 }
  0xfa   : > { %v251_v10 = vpop.permute.xlu1 %250 }
  0xfb   : > { %v253_v11 = vsel %vm222_vm1, %v248_v7, %v251_v10 }
  0xfc   : > { %255 = vrot.lane.b32.xlu2 %v253_v11, %s379_s27 }
 0x14e   : > { %v226_v12 = vpop.permute.xlu2 %225 }
 0x14f   : > { %v229_v13 = vsel %vm228_vm2, %v223_v9, %v226_v12 }
 0x150   : > { %231 = vrot.lane.b32.xlu0 %v229_v13, %s380_s28 }
 0x156   : > { %v256_v14 = vpop.permute.xlu2 %255 }
 0x157   : > { %v258_v15 = vsel %vm228_vm2, %v253_v11, %v256_v14 }
 0x158   : > { %260 = vrot.lane.b32.xlu1 %v258_v15, %s380_s28 }
 0x1c2   : > { %v232_v16 = vpop.permute.xlu0 %231 }
 0x1c3   : > { %v235_v17 = vsel %vm234_vm3, %v229_v13, %v232_v16 }
 0x1c4   : > { %237 = vrot.lane.b32.xlu2 %v235_v17, %s381_s29 }
 0x1ca   : > { %v261_v18 = vpop.permute.xlu1 %260 }
 0x1cb   : > { %v263_v19 = vsel %vm234_vm3, %v258_v15, %v261_v18 }
 0x1cc   : > { %265 = vrot.lane.b32.xlu0 %v263_v19, %s381_s29 }
 0x21e   : > { %v238_v20 = vpop.permute.xlu2 %237 }
 0x21f   : > { %v241_v21 = vsel %vm240_vm4, %v235_v17, %v238_v20 }
 0x220   : > { %v271_v24 = vperm.slane %v241_v21, 0 }
 0x222   : > { %v272_v27 = vmul.f32 %v271_v24, %v270_v23 }
 0x23e   : > { %v266_v25 = vpop.permute.xlu0 %265 }
 0x23f   : > { %v268_v26 = vsel %vm240_vm4, %v263_v19, %v266_v25 }
 0x240   : > { %v273_v28 = vperm.slane %v268_v26, 0 }
 0x242   : > { %v274_v30 = vadd.f32 %v273_v28, %v272_v27 }
 0x244   : > { %v276_v31 = vadd.f32 %v275_v29, %v274_v30 }
 0x246   : > { %v277_v32 = vmax.f32 %v276_v31, 0.0 }
 0x248   : > { %278 = vst [vmem:[%s209_s14] sm:$0xff] %v277_v32 }
 0x249 PF: > { %s14_s15 = sadd.s32 1, %s375_s15  }
 0x24a   : > { %p11_p4 = scmp.ge.s32.totalorder %s14_s15, 4  }
 0x24c   :  { %13 = sbr.rel (!%p11_p4) target bundleno = 1 (0x1), region = 69 }

// kernel: residual_block_forward.4
= control target key start
LH: loop header
LB: loop body
LE: loop exit
PB: predicated region body
PF: predicated region fallthrough
CT: control target
= control target key end

     0   :  { %s1988_s15 = smov 0   ;;  %s3049_s0 = inlined_call_operand.vmem [shape: bf16[2,16,16,4], index: 0, kind: input, shape index: {}]   ;;  %s3050_s1 = inlined_call_operand.vmem [shape: bf16[36,4], index: 1, kind: input, shape index: {}]   ;;  %s3051_s2 = inlined_call_operand.vmem [shape: bf16[2,256,4], index: 2, kind: output, shape index: {0}]   ;;  %s3052_s3 = inlined_call_operand.vmem [shape: f32[2,1,4], index: 3, kind: output, shape index: {1}]   ;;  %s3053_s4 = inlined_call_operand.vmem [shape: f32[2,1,4], index: 4, kind: output, shape index: {2}]  }
   0x1 LB: > { %s1801_s16 = sadd.s32 4294967295, %s1952_s15   ;;  %p1805_p0 = scmp.ge.s32.totalorder %s1952_s15, 1  ;;  %s1952_s15 = sphi %s1988_s15, %s15_s15  }
   0x2   : > { %p167_p1 = scmp.lt.s32.totalorder %s1952_s15, 3 }
   0x4   : > { %p168_p2 = pnand %p1805_p0, %p167_p1 }
   0x5   : > { %p199_p3 = scmp.lt.s32.totalorder (!%p168_p2), %s1801_s16, 1  ;;  %s1955_s17 = smov (!%p168_p2), 4  }
   0x6   : > { %171 = sbr.rel (%p168_p2) target bundleno = 645 (0x285), region = 28  ;;  %s1956_s22 = smov (!%p168_p2), 8  }
   0x7   : > { %s1957_s23 = smov (!%p168_p2), 16   ;;  %s1958_s24 = smov (!%p168_p2), 12  }
   0x8   : > { %s1959_s25 = smov (!%p168_p2), 20   ;;  %s1960_s26 = smov (!%p168_p2), 28  }
   0x9   : > { %s1961_s27 = smov (!%p168_p2), 24   ;;  %s1962_s28 = smov (!%p168_p2), 32  }
   0xb   : > { %v1954_v0 = vmov 0   ;;  %s3057_s16 = smov (!%p199_p3, %s1801_s16), 1  ;;  %vm472_vm0 = vcmask 1040384   ;;  %vm473_vm1 = vsmask.f32 256  ;;  %vm759_vm4 = vcmask 1046528  }
   0xc   : > { %v1997_v1 = vrot.slane %v1954_v0, 1  ;;  %s1900_s18 = sshll.u32 %s3057_s16, 7  ;;  %vm507_vm2 = vsmask.f32 7424  ;;  %vm2021_vm3 = vmand %vm472_vm0, %vm473_vm1  ;;  %vm1081_vm5 = vcmask 64512   ;;  %vm1048_vm6 = vcmask 31744   ;;  %s211_s14 = scalar_lea.vmem %s3052_s3, %s3057_s16 }
   0xd   : > { %s2009_s21 = scalar_lea.vmem %s3049_s0, %s1900_s18  ;;  %vm1365_vm7 = vcmask 1041408   ;;  %vm1114_vm8 = vcmask 97280   ;;  %vm1147_vm9 = vcmask 130048   ;;  %vm1180_vm10 = vcmask 162816   ;;  %s2755_s11 = scalar_lea.vmem %s3051_s2, %s1900_s18 }
   0xe   : > { %696 = vrot.lane.b32.xlu0 %v1997_v1, %s1955_s17  ;;  %v1905_v2 = vld [vmem:[%s2009_s21 + $0x18] sm:$0xff]  ;;  %v1903_v3 = vld [vmem:[%s2009_s21 + $0x8] sm:$0xff]  ;;  %v1902_v4 = vld [vmem:[%s2009_s21] sm:$0xff]  ;;  %vm1213_vm11 = vcmask 195584   ;;  %vm1246_vm12 = vcmask 228352   ;;  %vm1279_vm13 = vcmask 261120   ;;  %s214_s19 = scalar_lea.vmem %s3053_s4, %s3057_s16 }
   0xf   : > { %v1906_v5 = vld [vmem:[%s2009_s21 + $0x20] sm:$0xff]  ;;  %v1904_v6 = vld [vmem:[%s2009_s21 + $0x10] sm:$0xff]  ;;  %v2017_v7 = vld [vmem:[%s2009_s21 + $0x28] sm:$0xff]  ;;  %v350_v8 = vshrl.u32 %v1905_v2, 16  ;;  %v353_v9 = vshll.u32 %v1905_v2, 16  ;;  %v336_v10 = vshrl.u32 %v1903_v3, 16 }
  0x10   : > { %v339_v11 = vshll.u32 %v1903_v3, 16  ;;  %v329_v12 = vshrl.u32 %v1902_v4, 16  ;;  %v332_v13 = vshll.u32 %v1902_v4, 16  ;;  %v357_v14 = vshrl.u32 %v1906_v5, 16  ;;  %v1909_v45 = vld [vmem:[%s2009_s21 + $0x38] sm:$0xff] }
  0x11   : > { %v360_v15 = vshll.u32 %v1906_v5, 16  ;;  %v352_v16 = vrot.slane %v350_v8, 7  ;;  %v338_v17 = vrot.slane %v336_v10, 7  ;;  %v343_v18 = vshrl.u32 %v1904_v6, 16  ;;  %v1908_v8 = vld [vmem:[%s2009_s21 + $0x30] sm:$0xff] }
  0x12   : > { %v346_v19 = vshll.u32 %v1904_v6, 16  ;;  %v331_v21 = vrot.slane %v329_v12, 7  ;;  %v359_v22 = vrot.slane %v357_v14, 7  ;;  %v364_v23 = vshrl.u32 %v2017_v7, 16 }
  0x13   : > { %v367_v24 = vshll.u32 %v2017_v7, 16  ;;  %v355_v25 = vor.u32 %v353_v9, %v352_v16  ;;  %v2029_v26 = vsel %vm2021_vm3, %v352_v16, 0  ;;  %v341_v27 = vor.u32 %v339_v11, %v338_v17 }
  0x14   : > { %v2033_v28 = vsel %vm2021_vm3, %v338_v17, 0  ;;  %v560_v29 = vshll.u32 %v2029_v26, 16  ;;  %v334_v31 = vor.u32 %v332_v13, %v331_v21  ;;  %v2039_v32 = vsel %vm2021_vm3, %v331_v21, 0  ;;  %v1910_v13 = vld [vmem:[%s2009_s21 + $0x40] sm:$0xff] }
  0x15   : > { %v536_v30 = vshll.u32 %v2033_v28, 16  ;;  %v2043_v33 = vsel %vm2021_vm3, 0, %v355_v25  ;;  %v2047_v34 = vsel %vm2021_vm3, 0, %v341_v27  ;;  %v524_v35 = vshll.u32 %v2039_v32, 16 }
  0x16   : > { %v362_v36 = vor.u32 %v360_v15, %v359_v22  ;;  %v553_v37 = vshrl.u32 %v2043_v33, 16  ;;  %v555_v38 = vshll.u32 %v2043_v33, 16  ;;  %v562_v39 = vrot.slane %v560_v29, 1 }
  0x17   : > { %v529_v40 = vshrl.u32 %v2047_v34, 16  ;;  %v531_v41 = vshll.u32 %v2047_v34, 16  ;;  %v538_v42 = vrot.slane %v536_v30, 1  ;;  %v2056_v43 = vsel %vm2021_vm3, 0, %v334_v31 }
  0x18   : > { %v526_v44 = vrot.slane %v524_v35, 1  ;;  %v557_v46 = vrot.slane %v555_v38, 1  ;;  %v517_v47 = vshrl.u32 %v2056_v43, 16  ;;  %v519_v48 = vshll.u32 %v2056_v43, 16 }
  0x19   : > { %v2063_v49 = vsel %vm2021_vm3, 0, %v362_v36  ;;  %v533_v50 = vrot.slane %v531_v41, 1  ;;  %v2067_v51 = vsel %vm2021_vm3, %v359_v22, 0  ;;  %v345_v57 = vrot.slane %v343_v18, 7 }
  0x1a   : > { %v565_v52 = vshrl.u32 %v2063_v49, 16  ;;  %v567_v53 = vshll.u32 %v2063_v49, 16  ;;  %v558_v54 = vor.u32 %v557_v46, %v553_v37  ;;  %v521_v55 = vrot.slane %v519_v48, 1 }
  0x1b   : > { %v572_v56 = vshll.u32 %v2067_v51, 16  ;;  %v534_v58 = vor.u32 %v533_v50, %v529_v40  ;;  %v366_v60 = vrot.slane %v364_v23, 7  ;;  %v378_v61 = vshrl.u32 %v1909_v45, 16  ;;  %v1912_v50 = vld [vmem:[%s2009_s21 + $0x50] sm:$0xff] }
  0x1c   : > { %v569_v59 = vrot.slane %v567_v53, 1  ;;  %v2073_v62 = vsel %vm507_vm2, %v558_v54, %v562_v39  ;;  %v522_v63 = vor.u32 %v521_v55, %v517_v47  ;;  %v348_v3 = vor.u32 %v346_v19, %v345_v57 }
  0x1d   : > { %v574_v2 = vrot.slane %v572_v56, 1  ;;  %704 = vrot.lane.b32.xlu2 %v2073_v62, %s1955_s17  ;;  %v2078_v4 = vsel %vm507_vm2, %v534_v58, %v538_v42  ;;  %v2082_v6 = vsel %vm2021_vm3, %v345_v57, 0  ;;  %v369_v7 = vor.u32 %v367_v24, %v366_v60 }
  0x1e   : > { %v570_v5 = vor.u32 %v569_v59, %v565_v52  ;;  %700 = vrot.lane.b32.xlu1 %v2078_v4, %s1955_s17  ;;  %v2088_v9 = vsel %vm507_vm2, %v522_v63, %v526_v44  ;;  %v2092_v10 = vsel %vm2021_vm3, 0, %v348_v3  ;;  %v548_v11 = vshll.u32 %v2082_v6, 16 }
  0x1f   : > { %v2097_v12 = vsel %vm2021_vm3, %v366_v60, 0  ;;  %698 = vrot.lane.b32.xlu0 %v2088_v9, %s1955_s17  ;;  %v541_v15 = vshrl.u32 %v2092_v10, 16  ;;  %v543_v16 = vshll.u32 %v2092_v10, 16  ;;  %v2109_v17 = vsel %vm2021_vm3, 0, %v369_v7  ;;  %v1911_v60 = vld [vmem:[%s2009_s21 + $0x48] sm:$0xff] }
  0x20   : > { %v2103_v14 = vsel %vm507_vm2, %v570_v5, %v574_v2  ;;  %v550_v18 = vrot.slane %v548_v11, 1  ;;  %v577_v19 = vshrl.u32 %v2109_v17, 16  ;;  %v579_v21 = vshll.u32 %v2109_v17, 16  ;;  %v1913_v5 = vld [vmem:[%s2009_s21 + $0x58] sm:$0xff] }
  0x21   : > { %v584_v22 = vshll.u32 %v2097_v12, 16  ;;  %v545_v23 = vrot.slane %v543_v16, 1  ;;  %v380_v24 = vrot.slane %v378_v61, 7  ;;  %v381_v25 = vshll.u32 %v1909_v45, 16 }
  0x22   : > { %v371_v27 = vshrl.u32 %v1908_v8, 16  ;;  %v581_v29 = vrot.slane %v579_v21, 1  ;;  %v374_v31 = vshll.u32 %v1908_v8, 16  ;;  %v385_v35 = vshrl.u32 %v1910_v13, 16 }
  0x23   : > { %v586_v30 = vrot.slane %v584_v22, 1  ;;  %v546_v36 = vor.u32 %v545_v23, %v541_v15  ;;  %v383_v37 = vor.u32 %v381_v25, %v380_v24  ;;  %v2116_v38 = vsel %vm2021_vm3, %v380_v24, 0  ;;  %v1915_v25 = vld [vmem:[%s2009_s21 + $0x68] sm:$0xff] }
  0x24   : > { %v373_v39 = vrot.slane %v371_v27, 7  ;;  %v582_v40 = vor.u32 %v581_v29, %v577_v19  ;;  %v608_v41 = vshll.u32 %v2116_v38, 16  ;;  %v387_v42 = vrot.slane %v385_v35, 7 }
  0x25   : > { %v388_v44 = vshll.u32 %v1910_v13, 16  ;;  %706 = vrot.lane.b32.xlu2 %v2103_v14, %s1955_s17  ;;  %v2122_v45 = vsel %vm507_vm2, %v546_v36, %v550_v18  ;;  %v2126_v46 = vsel %vm2021_vm3, 0, %v383_v37  ;;  %v399_v11 = vshrl.u32 %v1912_v50, 16 }
  0x26   : > { %v376_v47 = vor.u32 %v374_v31, %v373_v39  ;;  %v2130_v48 = vsel %vm2021_vm3, %v373_v39, 0  ;;  %702 = vrot.lane.b32.xlu1 %v2122_v45, %s1955_s17  ;;  %v2136_v52 = vsel %vm507_vm2, %v582_v40, %v586_v30  ;;  %v601_v53 = vshrl.u32 %v2126_v46, 16 }
  0x27   : > { %v603_v54 = vshll.u32 %v2126_v46, 16  ;;  %v610_v55 = vrot.slane %v608_v41, 1  ;;  %708 = vrot.lane.b32.xlu0 %v2136_v52, %s1955_s17  ;;  %v596_v57 = vshll.u32 %v2130_v48, 16  ;;  %v390_v58 = vor.u32 %v388_v44, %v387_v42 }
  0x28   : > { %v2144_v56 = vsel %vm2021_vm3, 0, %v376_v47  ;;  %v2149_v59 = vsel %vm2021_vm3, %v387_v42, 0  ;;  %v402_v13 = vshll.u32 %v1912_v50, 16  ;;  %v401_v22 = vrot.slane %v399_v11, 7 }
  0x29   : > { %v605_v61 = vrot.slane %v603_v54, 1  ;;  %v589_v63 = vshrl.u32 %v2144_v56, 16  ;;  %v591_v2 = vshll.u32 %v2144_v56, 16  ;;  %v620_v3 = vshll.u32 %v2149_v59, 16 }
  0x2a   : > { %v598_v7 = vrot.slane %v596_v57, 1  ;;  %v2158_v8 = vsel %vm2021_vm3, 0, %v390_v58  ;;  %v392_v23 = vshrl.u32 %v1911_v60, 16  ;;  %v395_v24 = vshll.u32 %v1911_v60, 16 }
  0x2b   : > { %v606_v15 = vor.u32 %v605_v61, %v601_v53  ;;  %v593_v16 = vrot.slane %v591_v2, 1  ;;  %v613_v18 = vshrl.u32 %v2158_v8, 16  ;;  %v615_v19 = vshll.u32 %v2158_v8, 16 }
  0x2c   : > { %v622_v21 = vrot.slane %v620_v3, 1  ;;  %v406_v31 = vshrl.u32 %v1913_v5, 16  ;;  %v404_v35 = vor.u32 %v402_v13, %v401_v22  ;;  %v2170_v36 = vsel %vm2021_vm3, %v401_v22, 0  ;;  %v1916_v22 = vld [vmem:[%s2009_s21 + $0x70] sm:$0xff] }
  0x2d   : > { %v2164_v27 = vsel %vm507_vm2, %v606_v15, %v610_v55  ;;  %v594_v29 = vor.u32 %v593_v16, %v589_v63  ;;  %v617_v30 = vrot.slane %v615_v19, 1  ;;  %v394_v37 = vrot.slane %v392_v23, 7 }
  0x2e   : > { %712 = vrot.lane.b32.xlu2 %v2164_v27, %s1955_s17  ;;  %v409_v39 = vshll.u32 %v1913_v5, 16  ;;  %v644_v42 = vshll.u32 %v2170_v36, 16  ;;  %v408_v44 = vrot.slane %v406_v31, 7  ;;  %v2180_v47 = vsel %vm2021_vm3, 0, %v404_v35  ;;  %v1914_v5 = vld [vmem:[%s2009_s21 + $0x60] sm:$0xff] }
  0x2f   : > { %v2173_v40 = vsel %vm507_vm2, %v594_v29, %v598_v7  ;;  %v618_v41 = vor.u32 %v617_v30, %v613_v18  ;;  %v397_v50 = vor.u32 %v395_v24, %v394_v37  ;;  %v2184_v53 = vsel %vm2021_vm3, %v394_v37, 0 }
  0x30   : > { %710 = vrot.lane.b32.xlu1 %v2173_v40, %s1955_s17  ;;  %v420_v54 = vshrl.u32 %v1915_v25, 16  ;;  %v637_v57 = vshrl.u32 %v2180_v47, 16  ;;  %v639_v58 = vshll.u32 %v2180_v47, 16  ;;  %v646_v60 = vrot.slane %v644_v42, 1 }
  0x31   : > { %v2187_v55 = vsel %vm507_vm2, %v618_v41, %v622_v21  ;;  %v2195_v61 = vsel %vm2021_vm3, 0, %v397_v50  ;;  %v632_v63 = vshll.u32 %v2184_v53, 16  ;;  %v411_v2 = vor.u32 %v409_v39, %v408_v44 }
  0x32   : > { %714 = vrot.lane.b32.xlu0 %v2187_v55, %s1955_s17  ;;  %v2200_v3 = vsel %vm2021_vm3, %v408_v44, 0  ;;  %v641_v7 = vrot.slane %v639_v58, 1  ;;  %v625_v11 = vshrl.u32 %v2195_v61, 16  ;;  %v627_v13 = vshll.u32 %v2195_v61, 16 }
  0x33   : > { %v656_v15 = vshll.u32 %v2200_v3, 16  ;;  %v634_v16 = vrot.slane %v632_v63, 1  ;;  %v2208_v18 = vsel %vm2021_vm3, 0, %v411_v2  ;;  %v422_v19 = vrot.slane %v420_v54, 7 }
  0x34   : > { %v423_v21 = vshll.u32 %v1915_v25, 16  ;;  %v642_v23 = vor.u32 %v641_v7, %v637_v57  ;;  %v629_v24 = vrot.slane %v627_v13, 1  ;;  %v649_v29 = vshrl.u32 %v2208_v18, 16 }
  0x35   : > { %v651_v30 = vshll.u32 %v2208_v18, 16  ;;  %v658_v31 = vrot.slane %v656_v15, 1  ;;  %v2215_v37 = vsel %vm2021_vm3, %v422_v19, 0  ;;  %v413_v39 = vshrl.u32 %v1914_v5, 16 }
  0x36   : > { %v425_v35 = vor.u32 %v423_v21, %v422_v19  ;;  %v2218_v41 = vsel %vm507_vm2, %v642_v23, %v646_v60  ;;  %v630_v42 = vor.u32 %v629_v24, %v625_v11  ;;  %v680_v25 = vshll.u32 %v2215_v37, 16 }
  0x37   : > { %v653_v44 = vrot.slane %v651_v30, 1  ;;  %718 = vrot.lane.b32.xlu2 %v2218_v41, %s1955_s17  ;;  %v415_v54 = vrot.slane %v413_v39, 7  ;;  %v416_v57 = vshll.u32 %v1914_v5, 16  ;;  %v427_v58 = vshrl.u32 %v1916_v22, 16 }
  0x38   : > { %v2225_v50 = vsel %vm2021_vm3, 0, %v425_v35  ;;  %v2228_v63 = vsel %vm507_vm2, %v630_v42, %v634_v16  ;;  %v682_v11 = vrot.slane %v680_v25, 1  ;;  %v430_v23 = vshll.u32 %v1916_v22, 16 }
  0x39   : > { %v654_v2 = vor.u32 %v653_v44, %v649_v29  ;;  %v673_v60 = vshrl.u32 %v2225_v50, 16  ;;  %v675_v7 = vshll.u32 %v2225_v50, 16  ;;  %716 = vrot.lane.b32.xlu1 %v2228_v63, %s1955_s17  ;;  %v418_v13 = vor.u32 %v416_v57, %v415_v54 }
  0x3a   : > { %v2236_v15 = vsel %vm2021_vm3, %v415_v54, 0  ;;  %v429_v19 = vrot.slane %v427_v58, 7  ;;  %v762_v57 = vrot.slane %v2056_v43, 1  ;;  %vm1332_vm14 = vcmask 293888  }
  0x3b   : > { %v2239_v5 = vsel %vm507_vm2, %v654_v2, %v658_v31  ;;  %v677_v16 = vrot.slane %v675_v7, 1  ;;  %v668_v21 = vshll.u32 %v2236_v15, 16  ;;  %v2246_v24 = vsel %vm2021_vm3, 0, %v418_v13 }
  0x3c   : > { %720 = vrot.lane.b32.xlu0 %v2239_v5, %s1955_s17  ;;  %v2250_v29 = vsel %vm2021_vm3, %v429_v19, 0  ;;  %v661_v35 = vshrl.u32 %v2246_v24, 16  ;;  %v663_v31 = vshll.u32 %v2246_v24, 16  ;;  %v432_v39 = vor.u32 %v430_v23, %v429_v19 }
  0x3d   : > { %v678_v30 = vor.u32 %v677_v16, %v673_v60  ;;  %v670_v44 = vrot.slane %v668_v21, 1  ;;  %v692_v25 = vshll.u32 %v2250_v29, 16  ;;  %v763_v7 = vrot.slane %v2039_v32, 1 }
  0x3e   : > { %v665_v22 = vrot.slane %v663_v31, 1  ;;  %v2262_v54 = vsel %vm2021_vm3, 0, %v432_v39  ;;  %v765_v32 = vrot.slane %v2047_v34, 1  ;;  %v772_v31 = vrot.slane %v2029_v26, 1 }
  0x3f   : > { %v2255_v42 = vsel %vm507_vm2, %v678_v30, %v682_v11  ;;  %v685_v2 = vshrl.u32 %v2262_v54, 16  ;;  %v687_v60 = vshll.u32 %v2262_v54, 16  ;;  %v694_v19 = vrot.slane %v692_v25, 1 }
  0x40   : > { %724 = vrot.lane.b32.xlu2 %v2255_v42, %s1955_s17  ;;  %v666_v58 = vor.u32 %v665_v22, %v661_v35  ;;  %v764_v21 = vsel %vm759_vm4, %v762_v57, %v763_v7  ;;  %v766_v30 = vrot.slane %v2033_v28, 1  ;;  %v771_v35 = vrot.slane %v2043_v33, 1 }
  0x41   : > { %v689_v13 = vrot.slane %v687_v60, 1  ;;  %v768_v39 = vrot.slane %v2092_v10, 1  ;;  %v769_v22 = vrot.slane %v2082_v6, 1  ;;  %v774_v26 = vrot.slane %v2063_v49, 1 }
  0x42   : > { %v2269_v11 = vsel %vm507_vm2, %v666_v58, %v670_v44  ;;  %v767_v44 = vsel %vm759_vm4, %v765_v32, %v766_v30  ;;  %v2290_v25 = vsel %vm759_vm4, %v771_v35, %v772_v31  ;;  %v775_v57 = vrot.slane %v2067_v51, 1 }
  0x43   : > { %722 = vrot.lane.b32.xlu1 %v2269_v11, %s1955_s17  ;;  %v690_v16 = vor.u32 %v689_v13, %v685_v2  ;;  %v2294_v28 = vsel %vm759_vm4, %v768_v39, %v769_v22  ;;  %v780_v58 = vrot.slane %v2144_v56, 1  ;;  %v781_v6 = vrot.slane %v2130_v48, 1 }
  0x44   : > { %v2305_v2 = vsel %vm759_vm4, %v774_v26, %v775_v57  ;;  %v777_v60 = vrot.slane %v2109_v17, 1  ;;  %v778_v7 = vrot.slane %v2097_v12, 1  ;;  %v783_v51 = vrot.slane %v2126_v46, 1 }
  0x45   : > { %v2275_v23 = vsel %vm507_vm2, %v690_v16, %v694_v19  ;;  %v2310_v13 = vsel %vm759_vm4, %v780_v58, %v781_v6  ;;  %v784_v19 = vrot.slane %v2116_v38, 1  ;;  %v789_v16 = vrot.slane %v2195_v61, 1 }
  0x46   : > { %726 = vrot.lane.b32.xlu0 %v2275_v23, %s1955_s17  ;;  %v2318_v48 = vsel %vm759_vm4, %v777_v60, %v778_v7  ;;  %v790_v12 = vrot.slane %v2184_v53, 1  ;;  %v786_v32 = vrot.slane %v2158_v8, 1  ;;  %v787_v30 = vrot.slane %v2149_v59, 1 }
  0x47   : > { %v2328_v35 = vsel %vm759_vm4, %v783_v51, %v784_v19  ;;  %v792_v53 = vrot.slane %v2180_v47, 1  ;;  %v793_v39 = vrot.slane %v2170_v36, 1  ;;  %v798_v59 = vrot.slane %v2246_v24, 1 }
  0x48   : > { %809 = vrot.lane.b32.xlu2 %v764_v21, %s1956_s22  ;;  %v2331_v31 = vsel %vm759_vm4, %v789_v16, %v790_v12  ;;  %v2336_v38 = vsel %vm759_vm4, %v786_v32, %v787_v30  ;;  %v799_v22 = vrot.slane %v2236_v15, 1  ;;  %v795_v57 = vrot.slane %v2208_v18, 1 }
  0x49   : > { %v2347_v26 = vsel %vm759_vm4, %v792_v53, %v793_v39  ;;  %v796_v58 = vrot.slane %v2200_v3, 1  ;;  %v801_v15 = vrot.slane %v2225_v50, 1  ;;  %v802_v60 = vrot.slane %v2215_v37, 1 }
  0x4a   : > { %v2352_v6 = vsel %vm759_vm4, %v798_v59, %v799_v22  ;;  %vm1490_vm15 = vcmask 27648   ;;  %vm1592_vm0 = vcmask 24576  }
  0x4b   : > { %807 = vrot.lane.b32.xlu1 %v1997_v1, %s1956_s22  ;;  %v2359_v36 = vsel %vm759_vm4, %v795_v57, %v796_v58  ;;  %v2366_v3 = vsel %vm759_vm4, %v801_v15, %v802_v60 }
  0x4e   : > { %811 = vrot.lane.b32.xlu0 %v767_v44, %s1956_s22 }
  0x50   : > { %815 = vrot.lane.b32.xlu2 %v2290_v25, %s1956_s22 }
  0x53   : > { %813 = vrot.lane.b32.xlu1 %v2294_v28, %s1956_s22 }
  0x56   : > { %817 = vrot.lane.b32.xlu0 %v2305_v2, %s1956_s22 }
  0x58   : > { %821 = vrot.lane.b32.xlu2 %v2310_v13, %s1956_s22 }
  0x5b   : > { %819 = vrot.lane.b32.xlu1 %v2318_v48, %s1956_s22 }
  0x5e   : > { %823 = vrot.lane.b32.xlu0 %v2328_v35, %s1956_s22 }
  0x60   : > { %827 = vrot.lane.b32.xlu2 %v2331_v31, %s1956_s22 }
  0x63   : > { %825 = vrot.lane.b32.xlu1 %v2336_v38, %s1956_s22 }
  0x66   : > { %829 = vrot.lane.b32.xlu0 %v2347_v26, %s1956_s22 }
  0x68   : > { %833 = vrot.lane.b32.xlu2 %v2352_v6, %s1956_s22 }
  0x6b   : > { %831 = vrot.lane.b32.xlu1 %v2359_v36, %s1956_s22 }
  0x6e   : > { %835 = vrot.lane.b32.xlu0 %v2366_v3, %s1956_s22 }
  0x70   : > { %884 = vrot.lane.b32.xlu2 %v2088_v9, %s1957_s23 }
  0x73   : > { %840 = vrot.lane.b32.xlu1 %v2056_v43, %s1958_s24 }
  0x76   : > { %920 = vrot.lane.b32.xlu0 %v764_v21, %s1959_s25 }
  0x77   : > { %v705_v37 = vpop.permute.xlu2 %704 }
  0x78   : > { %984 = vrot.lane.b32.xlu2 %v2078_v4, %s1960_s26  ;;  %v1058_v22 = vsel %vm1048_vm6, %v2043_v33, %v705_v37 }
  0x7b   : > { %952 = vrot.lane.b32.xlu1 %v2047_v34, %s1961_s27 }
  0x7e   : > { %1016 = vrot.lane.b32.xlu0 %v767_v44, %s1962_s28 }
  0x7f   : > { %v2382_v9 = vpop.permute.xlu2 %706 }
  0x80   : > { %848 = vrot.lane.b32.xlu2 %v2063_v49, %s1958_s24  ;;  %v2389_v21 = vpop.permute.xlu0 %696 }
  0x83   : > { %842 = vrot.lane.b32.xlu1 %v2047_v34, %s1958_s24 }
  0x86   : > { %886 = vrot.lane.b32.xlu0 %v2078_v4, %s1957_s23 }
  0x88   : > { %922 = vrot.lane.b32.xlu2 %v767_v44, %s1959_s25  ;;  %v2391_v7 = vpop.permute.xlu2 %712 }
  0x8b   : > { %892 = vrot.lane.b32.xlu1 %v2103_v14, %s1957_s23 }
  0x8e   : > { %928 = vrot.lane.b32.xlu0 %v2305_v2, %s1959_s25 }
  0x90   : > { %960 = vrot.lane.b32.xlu2 %v2109_v17, %s1961_s27  ;;  %v701_v51 = vpop.permute.xlu1 %700 }
  0x91   : > { %v2399_v19 = vpop.permute.xlu2 %718  ;;  %v699_v16 = vpop.permute.xlu0 %698 }
  0x92   : > { %v1052_v32 = vsel %vm1048_vm6, %v2056_v43, %v699_v16 }
  0x93   : > { %954 = vrot.lane.b32.xlu1 %v2092_v10, %s1961_s27 }
  0x96   : > { %986 = vrot.lane.b32.xlu0 %v2122_v45, %s1960_s26 }
  0x98   : > { %1018 = vrot.lane.b32.xlu2 %v2294_v28, %s1962_s28  ;;  %v703_v4 = vpop.permute.xlu1 %702 }
  0x99   : > { %v2411_v12 = vpop.permute.xlu0 %708 }
  0x9a   : > { %v2407_v44 = vpop.permute.xlu2 %724 }
  0x9b   : > { %992 = vrot.lane.b32.xlu1 %v2136_v52, %s1960_s26 }
  0x9e   : > { %1024 = vrot.lane.b32.xlu0 %v2318_v48, %s1962_s28 }
  0xa0   : > { %900 = vrot.lane.b32.xlu2 %v2187_v55, %s1957_s23 }
  0xa2   : > { %v711_v30 = vpop.permute.xlu1 %710  ;;  %v810_v53 = vpop.permute.xlu2 %809 }
  0xa3   : > { %v2420_v39 = vsel %vm1081_vm5, %v1052_v32, %v810_v53  ;;  %856 = vrot.lane.b32.xlu1 %v2158_v8, %s1958_s24  ;;  %v1064_v60 = vsel %vm1048_vm6, %v2144_v56, %v711_v30 }
  0xa4   : > { %v2424_v59 = vpop.permute.xlu0 %714 }
  0xa6   : > { %936 = vrot.lane.b32.xlu0 %v2336_v38, %s1959_s25 }
  0xa8   : > { %1000 = vrot.lane.b32.xlu2 %v2228_v63, %s1960_s26 }
  0xaa   : > { %v816_v43 = vpop.permute.xlu2 %815 }
  0xab   : > { %v2433_v57 = vsel %vm1081_vm5, %v1058_v22, %v816_v43  ;;  %968 = vrot.lane.b32.xlu1 %v2195_v61, %s1961_s27  ;;  %v717_v58 = vpop.permute.xlu1 %716 }
  0xac   : > { %v1070_v53 = vsel %vm1048_vm6, %v2195_v61, %v717_v58 }
  0xae   : > { %1032 = vrot.lane.b32.xlu0 %v2331_v31, %s1962_s28  ;;  %v2439_v15 = vpop.permute.xlu0 %720 }
  0xb0   : > { %850 = vrot.lane.b32.xlu2 %v2109_v17, %s1958_s24 }
  0xb2   : > { %v822_v37 = vpop.permute.xlu2 %821 }
  0xb3   : > { %v2446_v16 = vsel %vm1081_vm5, %v1064_v60, %v822_v37  ;;  %844 = vrot.lane.b32.xlu1 %v2092_v10, %s1958_s24 }
  0xb5   : > { %v723_v32 = vpop.permute.xlu1 %722 }
  0xb6   : > { %888 = vrot.lane.b32.xlu0 %v2122_v45, %s1957_s23  ;;  %v1054_v45 = vsel %vm1048_vm6, %v2047_v34, %v701_v51  ;;  %v1056_v34 = vsel %vm1048_vm6, %v2092_v10, %v703_v4 }
  0xb8   : > { %924 = vrot.lane.b32.xlu2 %v2294_v28, %s1959_s25  ;;  %v2456_v22 = vpop.permute.xlu0 %726  ;;  %v1076_v28 = vsel %vm1048_vm6, %v2246_v24, %v723_v32 }
  0xba   : > { %v828_v30 = vpop.permute.xlu2 %827 }
  0xbb   : > { %v2459_v43 = vsel %vm1081_vm5, %v1070_v53, %v828_v30  ;;  %894 = vrot.lane.b32.xlu1 %v2136_v52, %s1957_s23 }
  0xbd   : > { %v2463_v60 = vpop.permute.xlu1 %807 }
  0xbe   : > { %930 = vrot.lane.b32.xlu0 %v2318_v48, %s1959_s25  ;;  %v1316_v48 = vld [vmem:[%s3050_s1 + $0x10] sm:$0x3] }
  0xbf   : > { %v1326_v32 = vunpack.c.l.b16 %v1316_v48  ;;  %v1919_v48 = vld [vmem:[%s3050_s1 + $0x8] sm:$0xff] }
  0xc0   : > { %962 = vrot.lane.b32.xlu2 %v2144_v56, %s1961_s27  ;;  %v812_v58 = vpop.permute.xlu0 %811 }
  0xc1   : > { %v2474_v53 = vsel %vm1081_vm5, %v1054_v45, %v812_v58  ;;  %v1329_v45 = vpack.c.b16 %v1326_v32, %v1326_v32  ;;  %v1918_v32 = vld [vmem:[%s3050_s1] sm:$0xff] }
  0xc2   : > { %v834_v37 = vpop.permute.xlu2 %833 }
  0xc3   : > { %v2477_v52 = vsel %vm1081_vm5, %v1076_v28, %v834_v37  ;;  %956 = vrot.lane.b32.xlu1 %v2043_v33, %s1961_s27  ;;  %v1060_v28 = vsel %vm1048_vm6, %v2063_v49, %v2382_v9  ;;  %v1367_v10 = vsel %vm1365_vm7, %v1329_v45, 0  ;;  %v1062_v9 = vsel %vm1048_vm6, %v2109_v17, %v2411_v12 }
  0xc4   : > { %1374 = vmatpush.bf16.msra.mxu0 %v1367_v10  ;;  %1920 = vmatpush.bf16.msra.mxu1 %v1367_v10  ;;  %v1066_v17 = vsel %vm1048_vm6, %v2126_v46, %v2391_v7 }
  0xc5   : > { %v814_v51 = vpop.permute.xlu1 %813  ;;  %1921 = vmatpush.bf16.msra.mxu2 %v1367_v10  ;;  %1922 = vmatpush.bf16.msra.mxu3 %v1367_v10 }
  0xc6   : > { %v2487_v30 = vsel %vm1081_vm5, %v1056_v34, %v814_v51  ;;  %988 = vrot.lane.b32.xlu0 %v2073_v62, %s1960_s26 }
  0xc8   : > { %1020 = vrot.lane.b32.xlu2 %v2290_v25, %s1962_s28  ;;  %v818_v58 = vpop.permute.xlu0 %817  ;;  %1375 = vmatpush.bf16.msra.mxu0 %v1919_v48 }
  0xc9   : > { %v2497_v4 = vsel %vm1081_vm5, %v1060_v28, %v818_v58  ;;  %1923 = vmatpush.bf16.msra.mxu1 %v1919_v48  ;;  %1924 = vmatpush.bf16.msra.mxu2 %v1919_v48  ;;  %v1068_v58 = vsel %vm1048_vm6, %v2158_v8, %v2424_v59  ;;  %v1074_v59 = vsel %vm1048_vm6, %v2208_v18, %v2439_v15  ;;  %v1050_v15 = vsel %vm1048_vm6, 0, %v2389_v21 }
  0xca   : > { %v885_v37 = vpop.permute.xlu2 %884  ;;  %1925 = vmatpush.bf16.msra.mxu3 %v1919_v48 }
  0xcb   : > { %994 = vrot.lane.b32.xlu1 %v2173_v40, %s1960_s26 }
  0xcc   : > { %1376 = vmatpush.bf16.msra.mxu0 %v1918_v32 }
  0xcd   : > { %v820_v34 = vpop.permute.xlu1 %819  ;;  %1926 = vmatpush.bf16.msra.mxu1 %v1918_v32  ;;  %1927 = vmatpush.bf16.msra.mxu2 %v1918_v32 }
  0xce   : > { %v2508_v51 = vsel %vm1081_vm5, %v1062_v9, %v820_v34  ;;  %1026 = vrot.lane.b32.xlu0 %v2310_v13, %s1962_s28  ;;  %1928 = vmatpush.bf16.msra.mxu3 %v1918_v32 }
  0xd0   : > { %864 = vrot.lane.b32.xlu2 %v2246_v24, %s1958_s24  ;;  %v824_v12 = vpop.permute.xlu0 %823 }
  0xd1   : > { %v2521_v28 = vsel %vm1081_vm5, %v1066_v17, %v824_v12 }
  0xd2   : > { %v985_v45 = vpop.permute.xlu2 %984 }
  0xd3   : > { %858 = vrot.lane.b32.xlu1 %v2195_v61, %s1958_s24  ;;  %v1072_v61 = vsel %vm1048_vm6, %v2180_v47, %v2399_v19 }
  0xd5   : > { %v826_v10 = vpop.permute.xlu1 %825 }
  0xd6   : > { %v2529_v48 = vsel %vm1081_vm5, %v1068_v58, %v826_v10  ;;  %902 = vrot.lane.b32.xlu0 %v2228_v63, %s1957_s23  ;;  %v1083_v10 = vsel %vm1081_vm5, %v1050_v15, %v2463_v60 }
  0xd8   : > { %938 = vrot.lane.b32.xlu2 %v2331_v31, %s1959_s25  ;;  %v830_v7 = vpop.permute.xlu0 %829  ;;  %v1078_v31 = vsel %vm1048_vm6, %v2225_v50, %v2407_v44 }
  0xd9   : > { %v2539_v34 = vsel %vm1081_vm5, %v1072_v61, %v830_v7 }
  0xda   : > { %v849_v9 = vpop.permute.xlu2 %848 }
  0xdb   : > { %908 = vrot.lane.b32.xlu1 %v2269_v11, %s1957_s23 }
  0xdd   : > { %v832_v63 = vpop.permute.xlu1 %831 }
  0xde   : > { %v2547_v32 = vsel %vm1081_vm5, %v1074_v59, %v832_v63  ;;  %944 = vrot.lane.b32.xlu0 %v2352_v6, %s1959_s25 }
  0xe0   : > { %976 = vrot.lane.b32.xlu2 %v2225_v50, %s1961_s27  ;;  %v836_v19 = vpop.permute.xlu0 %835 }
  0xe1   : > { %v2557_v12 = vsel %vm1081_vm5, %v1078_v31, %v836_v19 }
  0xe2   : > { %v923_v17 = vpop.permute.xlu2 %922 }
  0xe3   : > { %970 = vrot.lane.b32.xlu1 %v2180_v47, %s1961_s27 }
  0xe5   : > { %v841_v58 = vpop.permute.xlu1 %840 }
  0xe6   : > { %1002 = vrot.lane.b32.xlu0 %v2218_v41, %s1960_s26  ;;  %v1116_v44 = vsel %vm1114_vm8, %v1083_v10, %v841_v58 }
  0xe7   : > { %v1149_v59 = vsel %vm1147_vm9, %v1116_v44, %v885_v37 }
  0xe8   : > { %1034 = vrot.lane.b32.xlu2 %v2347_v26, %s1962_s28  ;;  %v921_v61 = vpop.permute.xlu0 %920 }
  0xe9   : > { %v1182_v21 = vsel %vm1180_vm10, %v1149_v59, %v921_v61  ;;  %v1124_v59 = vsel %vm1114_vm8, %v2433_v57, %v849_v9 }
  0xea   : > { %v961_v7 = vpop.permute.xlu2 %960 }
  0xeb   : > { %1008 = vrot.lane.b32.xlu1 %v2255_v42, %s1960_s26 }
  0xed   : > { %v953_v60 = vpop.permute.xlu1 %952 }
  0xee   : > { %v1215_v63 = vsel %vm1213_vm11, %v1182_v21, %v953_v60  ;;  %1040 = vrot.lane.b32.xlu0 %v2366_v3, %s1962_s28 }
  0xef   : > { %v1248_v31 = vsel %vm1246_vm12, %v1215_v63, %v985_v45 }
  0xf0   : > { %852 = vrot.lane.b32.xlu2 %v2144_v56, %s1958_s24  ;;  %v1017_v37 = vpop.permute.xlu0 %1016 }
  0xf1   : > { %v1281_v15 = vsel %vm1279_vm13, %v1248_v31, %v1017_v37 }
  0xf2   : > { %v1019_v19 = vpop.permute.xlu2 %1018  ;;  %1882 = vmatmul.msk.bf16.vlgmr.msra.gmra.mxu0 %vm1332_vm14, %v1281_v15 }
  0xf3   : > { %846 = vrot.lane.b32.xlu1 %v2043_v33, %s1958_s24 }
  0xf5   : > { %v843_v58 = vpop.permute.xlu1 %842 }
  0xf6   : > { %890 = vrot.lane.b32.xlu0 %v2073_v62, %s1957_s23  ;;  %v1118_v33 = vsel %vm1114_vm8, %v2420_v39, %v843_v58 }
  0xf8   : > { %926 = vrot.lane.b32.xlu2 %v2290_v25, %s1959_s25  ;;  %v887_v45 = vpop.permute.xlu0 %886 }
  0xf9   : > { %v1151_v61 = vsel %vm1147_vm9, %v1118_v33, %v887_v45  ;;  %v805_v33 = vrot.slane %v2250_v29, 1 }
  0xfa   : > { %v901_v10 = vpop.permute.xlu2 %900 }
  0xfb   : > { %896 = vrot.lane.b32.xlu1 %v2173_v40, %s1957_s23  ;;  %v1184_v40 = vsel %vm1180_vm10, %v1151_v61, %v923_v17 }
  0xfd   : > { %v893_v56 = vpop.permute.xlu1 %892 }
  0xfe   : > { %932 = vrot.lane.b32.xlu0 %v2310_v13, %s1959_s25  ;;  %v1157_v39 = vsel %vm1147_vm9, %v1124_v59, %v893_v56 }
 0x100   : > { %964 = vrot.lane.b32.xlu2 %v2126_v46, %s1961_s27  ;;  %v929_v44 = vpop.permute.xlu0 %928 }
 0x101   : > { %v1190_v63 = vsel %vm1180_vm10, %v1157_v39, %v929_v44 }
 0x102   : > { %v1001_v62 = vpop.permute.xlu2 %1000  ;;  %v1223_v57 = vsel %vm1213_vm11, %v1190_v63, %v961_v7 }
 0x103   : > { %958 = vrot.lane.b32.xlu1 %v2063_v49, %s1961_s27 }
 0x105   : > { %v955_v25 = vpop.permute.xlu1 %954 }
 0x106   : > { %990 = vrot.lane.b32.xlu0 %v2103_v14, %s1960_s26  ;;  %v1217_v13 = vsel %vm1213_vm11, %v1184_v40, %v955_v25 }
 0x108   : > { %1022 = vrot.lane.b32.xlu2 %v2305_v2, %s1962_s28  ;;  %v987_v21 = vpop.permute.xlu0 %986 }
 0x109   : > { %v1250_v49 = vsel %vm1246_vm12, %v1217_v13, %v987_v21 }
 0x10a   : > { %v851_v60 = vpop.permute.xlu2 %850  ;;  %v1283_v17 = vsel %vm1279_vm13, %v1250_v49, %v1019_v19 }
 0x10b   : > { %996 = vrot.lane.b32.xlu1 %v2164_v27, %s1960_s26  ;;  %1883 = vmatmul.msk.bf16.gmra.mxu0 %vm1332_vm14, %v1283_v17  ;;  %v1126_v49 = vsel %vm1114_vm8, %v2497_v4, %v851_v60 }
 0x10d   : > { %v993_v14 = vpop.permute.xlu1 %992 }
 0x10e   : > { %1028 = vrot.lane.b32.xlu0 %v2328_v35, %s1962_s28  ;;  %v1256_v2 = vsel %vm1246_vm12, %v1223_v57, %v993_v14 }
 0x110   : > { %866 = vrot.lane.b32.xlu2 %v2225_v50, %s1958_s24  ;;  %v1025_v9 = vpop.permute.xlu0 %1024 }
 0x111   : > { %v1289_v37 = vsel %vm1279_vm13, %v1256_v2, %v1025_v9 }
 0x112   : > { %v925_v31 = vpop.permute.xlu2 %924  ;;  %1886 = vmatmul.msk.bf16.vlgmr.msra.gmra.mxu1 %vm1332_vm14, %v1289_v37 }
 0x113   : > { %860 = vrot.lane.b32.xlu1 %v2180_v47, %s1958_s24 }
 0x115   : > { %v857_v19 = vpop.permute.xlu1 %856 }
 0x116   : > { %904 = vrot.lane.b32.xlu0 %v2218_v41, %s1957_s23  ;;  %v1132_v7 = vsel %vm1114_vm8, %v2521_v28, %v857_v19 }
 0x117   : > { %v1165_v58 = vsel %vm1147_vm9, %v1132_v7, %v901_v10 }
 0x118   : > { %940 = vrot.lane.b32.xlu2 %v2347_v26, %s1959_s25  ;;  %v937_v50 = vpop.permute.xlu0 %936 }
 0x119   : > { %v1198_v45 = vsel %vm1180_vm10, %v1165_v58, %v937_v50 }
 0x11a   : > { %v963_v15 = vpop.permute.xlu2 %962 }
 0x11b   : > { %910 = vrot.lane.b32.xlu1 %v2255_v42, %s1957_s23 }
 0x11d   : > { %v969_v47 = vpop.permute.xlu1 %968 }
 0x11e   : > { %v1231_v56 = vsel %vm1213_vm11, %v1198_v45, %v969_v47  ;;  %946 = vrot.lane.b32.xlu0 %v2366_v3, %s1959_s25  ;;  %v804_v3 = vrot.slane %v2262_v54, 1 }
 0x11f   : > { %v1264_v41 = vsel %vm1246_vm12, %v1231_v56, %v1001_v62 }
 0x120   : > { %978 = vrot.lane.b32.xlu2 %v2262_v54, %s1961_s27  ;;  %v1033_v26 = vpop.permute.xlu0 %1032  ;;  %v2655_v61 = vsel %vm759_vm4, %v804_v3, %v805_v33 }
 0x121   : > { %v1297_v10 = vsel %vm1279_vm13, %v1264_v41, %v1033_v26 }
 0x122   : > { %v1021_v28 = vpop.permute.xlu2 %1020  ;;  %1890 = vmatmul.msk.bf16.vlgmr.msra.gmra.mxu2 %vm1332_vm14, %v1297_v10 }
 0x123   : > { %972 = vrot.lane.b32.xlu1 %v2208_v18, %s1961_s27 }
 0x125   : > { %v845_v42 = vpop.permute.xlu1 %844 }
 0x126   : > { %1004 = vrot.lane.b32.xlu0 %v2239_v5, %s1960_s26  ;;  %v1120_v29 = vsel %vm1114_vm8, %v2474_v53, %v845_v42 }
 0x128   : > { %1036 = vrot.lane.b32.xlu2 %v2359_v36, %s1962_s28  ;;  %v889_v44 = vpop.permute.xlu0 %888 }
 0x129   : > { %v1153_v13 = vsel %vm1147_vm9, %v1120_v29, %v889_v44 }
 0x12a   : > { %v2650_v62 = vpop.permute.xlu2 %864  ;;  %v1186_v21 = vsel %vm1180_vm10, %v1153_v13, %v925_v31 }
 0x12b   : > { %1010 = vrot.lane.b32.xlu1 %v2275_v23, %s1960_s26  ;;  %v1140_v33 = vsel %vm1114_vm8, %v2547_v32, %v2650_v62 }
 0x12d   : > { %v895_v25 = vpop.permute.xlu1 %894 }
 0x12e   : > { %1042 = vrot.lane.b32.xlu0 %v2655_v61, %s1962_s28  ;;  %v1159_v53 = vsel %vm1147_vm9, %v1126_v49, %v895_v25 }
 0x130   : > { %898 = vrot.lane.b32.xlu2 %v2164_v27, %s1957_s23  ;;  %v931_v40 = vpop.permute.xlu0 %930 }
 0x131   : > { %v1192_v57 = vsel %vm1180_vm10, %v1159_v53, %v931_v40 }
 0x132   : > { %v939_v59 = vpop.permute.xlu2 %938 }
 0x133   : > { %854 = vrot.lane.b32.xlu1 %v2126_v46, %s1958_s24  ;;  %v1917_v46 = vld [vmem:[%s2009_s21 + $0x78] sm:$0xff] }
 0x134   : > { %v434_v60 = vshrl.u32 %v1917_v46, 16  ;;  %v437_v19 = vshll.u32 %v1917_v46, 16 }
 0x135   : > { %v957_v39 = vpop.permute.xlu1 %956 }
 0x136   : > { %934 = vrot.lane.b32.xlu0 %v2328_v35, %s1959_s25  ;;  %v1219_v27 = vsel %vm1213_vm11, %v1186_v21, %v957_v39  ;;  %v436_v37 = vrot.slane %v434_v60, 7 }
 0x138   : > { %998 = vrot.lane.b32.xlu2 %v2187_v55, %s1960_s26  ;;  %v989_v63 = vpop.permute.xlu0 %988  ;;  %v1225_v55 = vsel %vm1213_vm11, %v1192_v57, %v963_v15  ;;  %v439_v50 = vor.u32 %v437_v19, %v436_v37 }
 0x139   : > { %v1252_v14 = vsel %vm1246_vm12, %v1219_v27, %v989_v63 }
 0x13a   : > { %v2675_v17 = vpop.permute.xlu2 %976  ;;  %v1285_v4 = vsel %vm1279_vm13, %v1252_v14, %v1021_v28  ;;  %v490_v58 = vsel %vm2021_vm3, 0, %v439_v50 }
 0x13b   : > { %966 = vrot.lane.b32.xlu1 %v2158_v8, %s1961_s27  ;;  %1884 = vmatmul.msk.bf16.gmra.mxu0 %vm1332_vm14, %v1285_v4  ;;  %v875_v45 = vshll.u32 %v490_v58, 16  ;;  %v917_v25 = vrot.slane %v490_v58, 1 }
 0x13d   : > { %v995_v35 = vpop.permute.xlu1 %994  ;;  %v877_v56 = vrot.slane %v875_v45, 1 }
 0x13e   : > { %1030 = vrot.lane.b32.xlu0 %v2336_v38, %s1962_s28  ;;  %v1258_v2 = vsel %vm1246_vm12, %v1225_v55, %v995_v35 }
 0x140   : > { %868 = vrot.lane.b32.xlu2 %v2262_v54, %s1958_s24  ;;  %v1027_v9 = vpop.permute.xlu0 %1026 }
 0x141   : > { %v1291_v8 = vsel %vm1279_vm13, %v1258_v2, %v1027_v9 }
 0x142   : > { %v1035_v31 = vpop.permute.xlu2 %1034  ;;  %1887 = vmatmul.msk.bf16.gmra.mxu1 %vm1332_vm14, %v1291_v8 }
 0x143   : > { %862 = vrot.lane.b32.xlu1 %v2208_v18, %s1958_s24  ;;  %v506_v18 = vsel %vm2021_vm3, %v436_v37, 0 }
 0x144   : > { %v880_v41 = vshll.u32 %v506_v18, 16  ;;  %v918_v29 = vrot.slane %v506_v18, 1 }
 0x145   : > { %v859_v7 = vpop.permute.xlu1 %858 }
 0x146   : > { %906 = vrot.lane.b32.xlu0 %v2239_v5, %s1957_s23  ;;  %v1134_v5 = vsel %vm1114_vm8, %v2529_v48, %v859_v7  ;;  %v882_v10 = vrot.slane %v880_v41, 1 }
 0x148   : > { %942 = vrot.lane.b32.xlu2 %v2359_v36, %s1959_s25  ;;  %v903_v38 = vpop.permute.xlu0 %902  ;;  %v873_v36 = vshrl.u32 %v490_v58, 16 }
 0x14a   : > { %v2698_v15 = vpop.permute.xlu2 %852  ;;  %v878_v20 = vor.u32 %v877_v56, %v873_v36 }
 0x14b   : > { %912 = vrot.lane.b32.xlu1 %v2275_v23, %s1957_s23  ;;  %v1167_v23 = vsel %vm1147_vm9, %v1134_v5, %v903_v38  ;;  %v1128_v55 = vsel %vm1114_vm8, %v2508_v51, %v2698_v15 }
 0x14c   : > { %v1200_v3 = vsel %vm1180_vm10, %v1167_v23, %v939_v59 }
 0x14d   : > { %v909_v47 = vpop.permute.xlu1 %908 }
 0x14e   : > { %948 = vrot.lane.b32.xlu0 %v2655_v61, %s1959_s25  ;;  %v1173_v44 = vsel %vm1147_vm9, %v1140_v33, %v909_v47 }
 0x150   : > { %980 = vrot.lane.b32.xlu2 %v490_v58, %s1961_s27  ;;  %v945_v26 = vpop.permute.xlu0 %944 }
 0x151   : > { %v1206_v13 = vsel %vm1180_vm10, %v1173_v44, %v945_v26 }
 0x152   : > { %v927_v28 = vpop.permute.xlu2 %926  ;;  %v1239_v39 = vsel %vm1213_vm11, %v1206_v13, %v2675_v17 }
 0x153   : > { %974 = vrot.lane.b32.xlu1 %v2246_v24, %s1961_s27  ;;  %v883_v24 = vsel %vm507_vm2, %v878_v20, %v882_v10 }
 0x155   : > { %v971_v42 = vpop.permute.xlu1 %970 }
 0x156   : > { %1006 = vrot.lane.b32.xlu0 %v2269_v11, %s1960_s26  ;;  %v1233_v48 = vsel %vm1213_vm11, %v1200_v3, %v971_v42  ;;  %v919_v11 = vsel %vm759_vm4, %v917_v25, %v918_v29 }
 0x158   : > { %1038 = vrot.lane.b32.xlu2 %v2352_v6, %s1962_s28  ;;  %v1003_v40 = vpop.permute.xlu0 %1002 }
 0x159   : > { %v1266_v59 = vsel %vm1246_vm12, %v1233_v48, %v1003_v40 }
 0x15a   : > { %v1299_v32 = vsel %vm1279_vm13, %v1266_v59, %v1035_v31  ;;  %v965_v6 = vpop.permute.xlu2 %964 }
 0x15b   : > { %1012 = vrot.lane.b32.xlu1 %v883_v24, %s1960_s26  ;;  %1891 = vmatmul.msk.bf16.gmra.mxu2 %vm1332_vm14, %v1299_v32 }
 0x15d   : > { %v1009_v62 = vpop.permute.xlu1 %1008 }
 0x15e   : > { %1044 = vrot.lane.b32.xlu0 %v919_v11, %s1962_s28  ;;  %v1272_v21 = vsel %vm1246_vm12, %v1239_v39, %v1009_v62 }
 0x160   : > { %870 = vrot.lane.b32.xlu2 %v490_v58, %s1958_s24  ;;  %v1041_v49 = vpop.permute.xlu0 %1040 }
 0x161   : > { %v1305_v27 = vsel %vm1279_vm13, %v1272_v21, %v1041_v49 }
 0x162   : > { %1894 = vmatmul.msk.bf16.vlgmr.msra.gmra.mxu3 %vm1332_vm14, %v1305_v27  ;;  %v1023_v63 = vpop.permute.xlu2 %1022 }
 0x163   : > { %837 = vrot.lane.b32.xlu1 %v2655_v61, %s1956_s22 }
 0x165   : > { %v847_v53 = vpop.permute.xlu1 %846 }
 0x166   : > { %914 = vrot.lane.b32.xlu0 %v883_v24, %s1957_s23  ;;  %v1122_v14 = vsel %vm1114_vm8, %v2487_v30, %v847_v53 }
 0x168   : > { %982 = vrot.lane.b32.xlu2 %v1954_v0, %s1961_s27  ;;  %v891_v17 = vpop.permute.xlu0 %890 }
 0x169   : > { %v1155_v35 = vsel %vm1147_vm9, %v1122_v14, %v891_v17 }
 0x16a   : > { %v2748_v57 = vpop.permute.xlu2 %866  ;;  %v1188_v60 = vsel %vm1180_vm10, %v1155_v35, %v927_v28 }
 0x16b   : > { %950 = vrot.lane.b32.xlu1 %v919_v11, %s1959_s25 }
 0x16d   : > { %v897_v46 = vpop.permute.xlu1 %896 }
 0x16e   : > { %1014 = vrot.lane.b32.xlu0 %v1997_v1, %s1960_s26  ;;  %v1161_v31 = vsel %vm1147_vm9, %v1128_v55, %v897_v46  ;;  %v1142_v46 = vsel %vm1114_vm8, %v2477_v52, %v2748_v57 }
 0x16f   : > { %v1378_v0 = vpop.f32.mrf.mxu0 }
 0x170   : > { %v1458_v61 = vpack.c.bf16 %v1378_v0, %v1378_v0  ;;  %v933_v4 = vpop.permute.xlu0 %932  ;;  %v1594_v2 = vmul.f32 %v1378_v0, %v1378_v0  ;;  %v1523_v19 = vsel %vm1048_vm6, %v1378_v0, 0.0 }
 0x171   : > { %v1194_v51 = vsel %vm1180_vm10, %v1161_v31, %v933_v4 }
 0x172   : > { %1491 = vst.msk [vmem:[%s2755_s11] sm:$0xf] %vm1490_vm15, %v1458_v61  ;;  %v941_v38 = vpop.permute.xlu2 %940  ;;  %v1626_v47 = vsel %vm1048_vm6, %v1594_v2, 0.0  ;;  %v1227_v56 = vsel %vm1213_vm11, %v1194_v51, %v965_v6 }
 0x173   : > { %1046 = vrot.lane.b32.xlu1 %v1997_v1, %s1962_s28 }
 0x175   : > { %v959_v30 = vpop.permute.xlu1 %958 }
 0x176   : > { %v1221_v9 = vsel %vm1213_vm11, %v1188_v60, %v959_v30 }
 0x177   : > { %v1380_v37 = vpop.f32.mrf.mxu0 }
 0x178   : > { %v1459_v8 = vpack.c.bf16 %v1380_v37, %v1380_v37  ;;  %v1524_v7 = vsel %vm1048_vm6, %v1380_v37, 0.0  ;;  %v1595_v1 = vmul.f32 %v1380_v37, %v1380_v37  ;;  %v991_v50 = vpop.permute.xlu0 %990 }
 0x179   : > { %v1525_v58 = vadd.f32 %v1524_v7, %v1523_v19  ;;  %v1254_v45 = vsel %vm1246_vm12, %v1221_v9, %v991_v50 }
 0x17a   : > { %1492 = vst.msk [vmem:[%s2755_s11 + $0x4] sm:$0xf] %vm1490_vm15, %v1459_v8  ;;  %v1627_v15 = vsel %vm1048_vm6, %v1595_v1, 0.0  ;;  %v1287_v18 = vsel %vm1279_vm13, %v1254_v45, %v1023_v63  ;;  %v979_v23 = vpop.permute.xlu2 %978 }
 0x17b   : > { %v1628_v5 = vadd.f32 %v1627_v15, %v1626_v47  ;;  %1885 = vmatmul.msk.bf16.gmra.mxu0 %vm1332_vm14, %v1287_v18 }
 0x17d   : > { %v997_v36 = vpop.permute.xlu1 %996 }
 0x17e   : > { %v1260_v41 = vsel %vm1246_vm12, %v1227_v56, %v997_v36 }
 0x180   : > { %v1029_v26 = vpop.permute.xlu0 %1028 }
 0x181   : > { %v1293_v28 = vsel %vm1279_vm13, %v1260_v41, %v1029_v26 }
 0x182   : > { %1888 = vmatmul.msk.bf16.gmra.mxu1 %vm1332_vm14, %v1293_v28  ;;  %v1037_v40 = vpop.permute.xlu2 %1036 }
 0x185   : > { %v861_v20 = vpop.permute.xlu1 %860 }
 0x186   : > { %v1136_v59 = vsel %vm1114_vm8, %v2459_v43, %v861_v20 }
 0x188   : > { %v1383_v10 = vpop.f32.mrf.mxu0  ;;  %v905_v42 = vpop.permute.xlu0 %904 }
 0x189   : > { %v1460_v3 = vpack.c.bf16 %v1383_v10, %v1383_v10  ;;  %v1526_v33 = vsel %vm1048_vm6, %v1383_v10, 0.0  ;;  %v1596_v48 = vmul.f32 %v1383_v10, %v1383_v10  ;;  %v1169_v49 = vsel %vm1147_vm9, %v1136_v59, %v905_v42 }
 0x18a   : > { %v1527_v44 = vadd.f32 %v1526_v33, %v1525_v58  ;;  %v1202_v17 = vsel %vm1180_vm10, %v1169_v49, %v941_v38  ;;  %v899_v61 = vpop.permute.xlu2 %898 }
 0x18b   : > { %1493 = vst.msk [vmem:[%s2755_s11 + $0x8] sm:$0xf] %vm1490_vm15, %v1460_v3  ;;  %v1629_v24 = vsel %vm1048_vm6, %v1596_v48, 0.0 }
 0x18c   : > { %v1630_v25 = vadd.f32 %v1629_v24, %v1628_v5 }
 0x18d   : > { %v911_v29 = vpop.permute.xlu1 %910 }
 0x18e   : > { %v1175_v0 = vsel %vm1147_vm9, %v1142_v46, %v911_v29 }
 0x18f   : > { %v2788_v13 = vpop.f32.mrf.mxu1 }
 0x190   : > { %v1466_v32 = vpack.c.bf16 %v2788_v13, %v2788_v13  ;;  %v1385_v11 = vpop.f32.mrf.mxu0  ;;  %v947_v6 = vpop.permute.xlu0 %946 }
 0x191   : > { %v1461_v62 = vpack.c.bf16 %v1385_v11, %v1385_v11  ;;  %v1528_v39 = vsel %vm1048_vm6, %v1385_v11, 0.0  ;;  %v1597_v21 = vmul.f32 %v1385_v11, %v1385_v11  ;;  %v1208_v55 = vsel %vm1180_vm10, %v1175_v0, %v947_v6 }
 0x192   : > { %1499 = vst.msk [vmem:[%s2755_s11 + $0x20] sm:$0xf] %vm1490_vm15, %v1466_v32  ;;  %v1529_v27 = vadd.f32 %v1528_v39, %v1527_v44  ;;  %v1241_v2 = vsel %vm1213_vm11, %v1208_v55, %v979_v23  ;;  %v999_v37 = vpop.permute.xlu2 %998 }
 0x193   : > { %1494 = vst.msk [vmem:[%s2755_s11 + $0xc] sm:$0xf] %vm1490_vm15, %v1461_v62  ;;  %v1631_v43 = vsel %vm1048_vm6, %v1597_v21, 0.0 }
 0x194   : > { %v1632_v53 = vadd.f32 %v1631_v43, %v1630_v25 }
 0x195   : > { %v973_v63 = vpop.permute.xlu1 %972 }
 0x196   : > { %v1235_v14 = vsel %vm1213_vm11, %v1202_v17, %v973_v63 }
 0x197   : > { %v2805_v4 = vpop.f32.mrf.mxu1 }
 0x198   : > { %v1467_v35 = vpack.c.bf16 %v2805_v4, %v2805_v4  ;;  %v1005_v30 = vpop.permute.xlu0 %1004 }
 0x199   : > { %v1268_v60 = vsel %vm1246_vm12, %v1235_v14, %v1005_v30 }
 0x19a   : > { %1500 = vst.msk [vmem:[%s2755_s11 + $0x24] sm:$0xf] %vm1490_vm15, %v1467_v35  ;;  %v1301_v52 = vsel %vm1279_vm13, %v1268_v60, %v1037_v40  ;;  %v869_v45 = vpop.permute.xlu2 %868 }
 0x19b   : > { %1892 = vmatmul.msk.bf16.gmra.mxu2 %vm1332_vm14, %v1301_v52 }
 0x19d   : > { %v1011_v57 = vpop.permute.xlu1 %1010 }
 0x19e   : > { %v1274_v9 = vsel %vm1246_vm12, %v1241_v2, %v1011_v57 }
 0x1a0   : > { %v1043_v31 = vpop.permute.xlu0 %1042 }
 0x1a1   : > { %v1307_v19 = vsel %vm1279_vm13, %v1274_v9, %v1043_v31 }
 0x1a2   : > { %1895 = vmatmul.msk.bf16.gmra.mxu3 %vm1332_vm14, %v1307_v19  ;;  %v943_v41 = vpop.permute.xlu2 %942 }
 0x1a5   : > { %v855_v8 = vpop.permute.xlu1 %854  ;;  %v2819_v7 = vpop.f32.mrf.mxu2 }
 0x1a6   : > { %v1474_v1 = vpack.c.bf16 %v2819_v7, %v2819_v7  ;;  %v1130_v50 = vsel %vm1114_vm8, %v2446_v16, %v855_v8 }
 0x1a7   : > { %v1163_v58 = vsel %vm1147_vm9, %v1130_v50, %v899_v61 }
 0x1a8   : > { %1507 = vst.msk [vmem:[%s2755_s11 + $0x40] sm:$0xf] %vm1490_vm15, %v1474_v1  ;;  %v935_v38 = vpop.permute.xlu0 %934 }
 0x1a9   : > { %v1196_v47 = vsel %vm1180_vm10, %v1163_v58, %v935_v38 }
 0x1aa   : > { %v981_v24 = vpop.permute.xlu2 %980 }
 0x1ad   : > { %v967_v51 = vpop.permute.xlu1 %966  ;;  %v2829_v15 = vpop.f32.mrf.mxu2 }
 0x1ae   : > { %v1229_v18 = vsel %vm1213_vm11, %v1196_v47, %v967_v51  ;;  %v1475_v5 = vpack.c.bf16 %v2829_v15, %v2829_v15 }
 0x1af   : > { %v1262_v36 = vsel %vm1246_vm12, %v1229_v18, %v999_v37  ;;  %v1080_v37 = vsel %vm1048_vm6, %v2262_v54, %v2456_v22 }
 0x1b0   : > { %1508 = vst.msk [vmem:[%s2755_s11 + $0x44] sm:$0xf] %vm1490_vm15, %v1475_v5  ;;  %v1031_v16 = vpop.permute.xlu0 %1030 }
 0x1b1   : > { %v1295_v56 = vsel %vm1279_vm13, %v1262_v36, %v1031_v16 }
 0x1b2   : > { %1889 = vmatmul.msk.bf16.gmra.mxu1 %vm1332_vm14, %v1295_v56  ;;  %v1039_v14 = vpop.permute.xlu2 %1038 }
 0x1b5   : > { %v863_v26 = vpop.permute.xlu1 %862 }
 0x1b6   : > { %v1138_v25 = vsel %vm1114_vm8, %v2539_v34, %v863_v26 }
 0x1b8   : > { %v1388_v28 = vpop.f32.mrf.mxu0  ;;  %v907_v23 = vpop.permute.xlu0 %906 }
 0x1b9   : > { %v1462_v20 = vpack.c.bf16 %v1388_v28, %v1388_v28  ;;  %v1530_v10 = vsel %vm1048_vm6, %v1388_v28, 0.0  ;;  %v1598_v42 = vmul.f32 %v1388_v28, %v1388_v28  ;;  %v1171_v39 = vsel %vm1147_vm9, %v1138_v25, %v907_v23 }
 0x1ba   : > { %v1531_v3 = vadd.f32 %v1530_v10, %v1529_v27  ;;  %v1204_v43 = vsel %vm1180_vm10, %v1171_v39, %v943_v41  ;;  %v871_v31 = vpop.permute.xlu2 %870  ;;  %v1538_v39 = vsel %vm1048_vm6, %v2788_v13, 0.0 }
 0x1bb   : > { %1495 = vst.msk [vmem:[%s2755_s11 + $0x10] sm:$0xf] %vm1490_vm15, %v1462_v20  ;;  %v1633_v33 = vsel %vm1048_vm6, %v1598_v42, 0.0 }
 0x1bc   : > { %v1634_v48 = vadd.f32 %v1633_v33, %v1632_v53  ;;  %v1144_v53 = vsel %vm1114_vm8, %v2557_v12, %v869_v45 }
 0x1bd   : > { %v913_v44 = vpop.permute.xlu1 %912 }
 0x1be   : > { %v1177_v17 = vsel %vm1147_vm9, %v1144_v53, %v913_v44  ;;  %v1540_v53 = vsel %vm1048_vm6, %v2805_v4, 0.0 }
 0x1bf   : > { %v2845_v29 = vpop.f32.mrf.mxu1 }
 0x1c0   : > { %v1468_v40 = vpack.c.bf16 %v2845_v29, %v2845_v29  ;;  %v1390_v59 = vpop.f32.mrf.mxu0  ;;  %v949_v32 = vpop.permute.xlu0 %948 }
 0x1c1   : > { %v1463_v11 = vpack.c.bf16 %v1390_v59, %v1390_v59  ;;  %v1532_v6 = vsel %vm1048_vm6, %v1390_v59, 0.0  ;;  %v1599_v62 = vmul.f32 %v1390_v59, %v1390_v59  ;;  %v1210_v30 = vsel %vm1180_vm10, %v1177_v17, %v949_v32 }
 0x1c2   : > { %1501 = vst.msk [vmem:[%s2755_s11 + $0x28] sm:$0xf] %vm1490_vm15, %v1468_v40  ;;  %v1533_v21 = vadd.f32 %v1532_v6, %v1531_v3  ;;  %v1243_v55 = vsel %vm1213_vm11, %v1210_v30, %v981_v24  ;;  %v983_v47 = vpop.permute.xlu2 %982  ;;  %v1602_v59 = vmul.f32 %v2788_v13, %v2788_v13 }
 0x1c3   : > { %1496 = vst.msk [vmem:[%s2755_s11 + $0x14] sm:$0xf] %vm1490_vm15, %v1463_v11  ;;  %v1635_v34 = vsel %vm1048_vm6, %v1599_v62, 0.0 }
 0x1c4   : > { %v1636_v49 = vadd.f32 %v1635_v34, %v1634_v48 }
 0x1c5   : > { %v975_v27 = vpop.permute.xlu1 %974 }
 0x1c6   : > { %v1237_v63 = vsel %vm1213_vm11, %v1204_v43, %v975_v27  ;;  %v1641_v43 = vsel %vm1048_vm6, %v1602_v59, 0.0 }
 0x1c7   : > { %v2861_v46 = vpop.f32.mrf.mxu1 }
 0x1c8   : > { %v1469_v0 = vpack.c.bf16 %v2861_v46, %v2861_v46  ;;  %v1007_v61 = vpop.permute.xlu0 %1006 }
 0x1c9   : > { %v1270_v35 = vsel %vm1246_vm12, %v1237_v63, %v1007_v61  ;;  %v1604_v63 = vmul.f32 %v2845_v29, %v2845_v29  ;;  %v1605_v61 = vmul.f32 %v2861_v46, %v2861_v46 }
 0x1ca   : > { %1502 = vst.msk [vmem:[%s2755_s11 + $0x2c] sm:$0xf] %vm1490_vm15, %v1469_v0  ;;  %v1303_v60 = vsel %vm1279_vm13, %v1270_v35, %v1039_v14  ;;  %v1542_v0 = vsel %vm1048_vm6, %v2845_v29, 0.0 }
 0x1cb   : > { %1893 = vmatmul.msk.bf16.gmra.mxu2 %vm1332_vm14, %v1303_v60  ;;  %v1647_v29 = vsel %vm1048_vm6, %v1605_v61, 0.0 }
 0x1cd   : > { %v1013_v12 = vpop.permute.xlu1 %1012 }
 0x1ce   : > { %v1276_v52 = vsel %vm1246_vm12, %v1243_v55, %v1013_v12  ;;  %v1645_v55 = vsel %vm1048_vm6, %v1604_v63, 0.0 }
 0x1d0   : > { %v1045_v57 = vpop.permute.xlu0 %1044 }
 0x1d1   : > { %v1309_v2 = vsel %vm1279_vm13, %v1276_v52, %v1045_v57 }
 0x1d2   : > { %1896 = vmatmul.msk.bf16.gmra.mxu3 %vm1332_vm14, %v1309_v2 }
 0x1d5   : > { %v838_v9 = vpop.permute.xlu1 %837 }
 0x1d6   : > { %v1113_v19 = vsel %vm1081_vm5, %v1080_v37, %v838_v9 }
 0x1d7   : > { %v1146_v1 = vsel %vm1114_vm8, %v1113_v19, %v871_v31 }
 0x1d8   : > { %v915_v8 = vpop.permute.xlu0 %914 }
 0x1d9   : > { %v1179_v38 = vsel %vm1147_vm9, %v1146_v1, %v915_v8 }
 0x1dd   : > { %v951_v50 = vpop.permute.xlu1 %950 }
 0x1de   : > { %v2881_v58 = vpop.f32.mrf.mxu2  ;;  %v1212_v45 = vsel %vm1180_vm10, %v1179_v38, %v951_v50 }
 0x1df   : > { %v1476_v51 = vpack.c.bf16 %v2881_v58, %v2881_v58  ;;  %v1245_v54 = vsel %vm1213_vm11, %v1212_v45, %v983_v47 }
 0x1e0   : > { %v1015_v22 = vpop.permute.xlu0 %1014 }
 0x1e1   : > { %1509 = vst.msk [vmem:[%s2755_s11 + $0x48] sm:$0xf] %vm1490_vm15, %v1476_v51  ;;  %v1278_v18 = vsel %vm1246_vm12, %v1245_v54, %v1015_v22 }
 0x1e5   : > { %v1047_v5 = vpop.permute.xlu1 %1046  ;;  %v2890_v36 = vpop.f32.mrf.mxu3 }
 0x1e6   : > { %v1311_v16 = vsel %vm1279_vm13, %v1278_v18, %v1047_v5  ;;  %v1482_v56 = vpack.c.bf16 %v2890_v36, %v2890_v36  ;;  %v2895_v41 = vpop.f32.mrf.mxu2 }
 0x1e7   : > { %1897 = vmatmul.msk.bf16.gmra.mxu3 %vm1332_vm14, %v1311_v16  ;;  %v1477_v26 = vpack.c.bf16 %v2895_v41, %v2895_v41  ;;  %v1613_v63 = vmul.f32 %v2895_v41, %v2895_v41 }
 0x1e8   : > { %1515 = vst.msk [vmem:[%s2755_s11 + $0x60] sm:$0xf] %vm1490_vm15, %v1482_v56 }
 0x1e9   : > { %1510 = vst.msk [vmem:[%s2755_s11 + $0x4c] sm:$0xf] %vm1490_vm15, %v1477_v26 }
 0x1ed   : > { %v2904_v28 = vpop.f32.mrf.mxu3 }
 0x1ee   : > { %v1483_v23 = vpack.c.bf16 %v2904_v28, %v2904_v28 }
 0x1f0   : > { %1516 = vst.msk [vmem:[%s2755_s11 + $0x64] sm:$0xf] %vm1490_vm15, %v1483_v23 }
 0x1f8   : > { %v1393_v20 = vpop.f32.mrf.mxu0 }
 0x1f9   : > { %v1464_v10 = vpack.c.bf16 %v1393_v20, %v1393_v20  ;;  %v1534_v42 = vsel %vm1048_vm6, %v1393_v20, 0.0  ;;  %v1600_v3 = vmul.f32 %v1393_v20, %v1393_v20 }
 0x1fa   : > { %v1535_v33 = vadd.f32 %v1534_v42, %v1533_v21  ;;  %v1603_v21 = vmul.f32 %v2805_v4, %v2805_v4  ;;  %v1544_v4 = vsel %vm1048_vm6, %v2861_v46, 0.0 }
 0x1fb   : > { %1497 = vst.msk [vmem:[%s2755_s11 + $0x18] sm:$0xf] %vm1490_vm15, %v1464_v10  ;;  %v1637_v48 = vsel %vm1048_vm6, %v1600_v3, 0.0 }
 0x1fc   : > { %v1638_v44 = vadd.f32 %v1637_v48, %v1636_v49  ;;  %v1643_v14 = vsel %vm1048_vm6, %v1603_v21, 0.0  ;;  %v1610_v48 = vmul.f32 %v2819_v7, %v2819_v7 }
 0x1fe   : > { %v1657_v21 = vsel %vm1048_vm6, %v1610_v48, 0.0 }
 0x1ff   : > { %v1408_v24 = vpop.f32.mrf.mxu1 }
 0x200   : > { %v1470_v25 = vpack.c.bf16 %v1408_v24, %v1408_v24  ;;  %v1395_v40 = vpop.f32.mrf.mxu0  ;;  %v1606_v52 = vmul.f32 %v1408_v24, %v1408_v24  ;;  %v1546_v9 = vsel %vm1048_vm6, %v1408_v24, 0.0 }
 0x201   : > { %v1465_v32 = vpack.c.bf16 %v1395_v40, %v1395_v40  ;;  %v1536_v11 = vsel %vm1048_vm6, %v1395_v40, 0.0  ;;  %v1601_v6 = vmul.f32 %v1395_v40, %v1395_v40 }
 0x202   : > { %1503 = vst.msk [vmem:[%s2755_s11 + $0x30] sm:$0xf] %vm1490_vm15, %v1470_v25  ;;  %v1537_v62 = vadd.f32 %v1536_v11, %v1535_v33  ;;  %v1649_v8 = vsel %vm1048_vm6, %v1606_v52, 0.0  ;;  %v1611_v11 = vmul.f32 %v2829_v15, %v2829_v15 }
 0x203   : > { %1498 = vst.msk [vmem:[%s2755_s11 + $0x1c] sm:$0xf] %vm1490_vm15, %v1465_v32  ;;  %v1639_v34 = vsel %vm1048_vm6, %v1601_v6, 0.0  ;;  %v1554_v32 = vsel %vm1048_vm6, %v2819_v7, 0.0 }
 0x204   : > { %v1539_v49 = vadd.f32 %v1538_v39, %v1537_v62  ;;  %v1640_v27 = vadd.f32 %v1639_v34, %v1638_v44  ;;  %v1556_v34 = vsel %vm1048_vm6, %v2829_v15, 0.0  ;;  %v1659_v7 = vsel %vm1048_vm6, %v1611_v11, 0.0 }
 0x205   : > { %v1560_v15 = vsel %vm1048_vm6, %v2895_v41, 0.0 }
 0x206   : > { %v1541_v17 = vadd.f32 %v1540_v53, %v1539_v49  ;;  %v1642_v13 = vadd.f32 %v1641_v43, %v1640_v27  ;;  %v1612_v49 = vmul.f32 %v2881_v58, %v2881_v58  ;;  %v1558_v53 = vsel %vm1048_vm6, %v2881_v58, 0.0 }
 0x207   : > { %v1410_v35 = vpop.f32.mrf.mxu1 }
 0x208   : > { %v1543_v30 = vadd.f32 %v1542_v0, %v1541_v17  ;;  %v1644_v60 = vadd.f32 %v1643_v14, %v1642_v13  ;;  %v1471_v12 = vpack.c.bf16 %v1410_v35, %v1410_v35  ;;  %v1607_v31 = vmul.f32 %v1410_v35, %v1410_v35 }
 0x209   : > { %v1548_v1 = vsel %vm1048_vm6, %v1410_v35, 0.0  ;;  %v1661_v14 = vsel %vm1048_vm6, %v1612_v49, 0.0  ;;  %v1663_v35 = vsel %vm1048_vm6, %v1613_v63, 0.0 }
 0x20a   : > { %v1646_v57 = vadd.f32 %v1645_v55, %v1644_v60  ;;  %1504 = vst.msk [vmem:[%s2755_s11 + $0x34] sm:$0xf] %vm1490_vm15, %v1471_v12  ;;  %v1545_v2 = vadd.f32 %v1544_v4, %v1543_v30  ;;  %v1651_v38 = vsel %vm1048_vm6, %v1607_v31, 0.0 }
 0x20c   : > { %v1547_v37 = vadd.f32 %v1546_v9, %v1545_v2  ;;  %v1648_v19 = vadd.f32 %v1647_v29, %v1646_v57 }
 0x20e   : > { %v1549_v46 = vadd.f32 %v1548_v1, %v1547_v37  ;;  %v1650_v50 = vadd.f32 %v1649_v8, %v1648_v19 }
 0x210   : > { %v1652_v45 = vadd.f32 %v1651_v38, %v1650_v50 }
 0x21e   : > { %v1428_v47 = vpop.f32.mrf.mxu2 }
 0x21f   : > { %v1478_v51 = vpack.c.bf16 %v1428_v47, %v1428_v47  ;;  %v1614_v60 = vmul.f32 %v1428_v47, %v1428_v47  ;;  %v1562_v58 = vsel %vm1048_vm6, %v1428_v47, 0.0 }
 0x221   : > { %1511 = vst.msk [vmem:[%s2755_s11 + $0x50] sm:$0xf] %vm1490_vm15, %v1478_v51  ;;  %v1665_v52 = vsel %vm1048_vm6, %v1614_v60, 0.0 }
 0x225   : > { %v2948_v54 = vpop.f32.mrf.mxu3 }
 0x226   : > { %v1484_v22 = vpack.c.bf16 %v2948_v54, %v2948_v54  ;;  %v1430_v18 = vpop.f32.mrf.mxu2 }
 0x227   : > { %v1479_v5 = vpack.c.bf16 %v1430_v18, %v1430_v18  ;;  %v1615_v57 = vmul.f32 %v1430_v18, %v1430_v18  ;;  %v1564_v41 = vsel %vm1048_vm6, %v1430_v18, 0.0 }
 0x228   : > { %1517 = vst.msk [vmem:[%s2755_s11 + $0x68] sm:$0xf] %vm1490_vm15, %v1484_v22 }
 0x229   : > { %1512 = vst.msk [vmem:[%s2755_s11 + $0x54] sm:$0xf] %vm1490_vm15, %v1479_v5  ;;  %v1667_v37 = vsel %vm1048_vm6, %v1615_v57, 0.0 }
 0x22d   : > { %v2956_v16 = vpop.f32.mrf.mxu3 }
 0x22e   : > { %v1485_v56 = vpack.c.bf16 %v2956_v16, %v2956_v16 }
 0x22f   : > { %v1413_v26 = vpop.f32.mrf.mxu1 }
 0x230   : > { %1518 = vst.msk [vmem:[%s2755_s11 + $0x6c] sm:$0xf] %vm1490_vm15, %v1485_v56  ;;  %v1472_v23 = vpack.c.bf16 %v1413_v26, %v1413_v26  ;;  %v1608_v20 = vmul.f32 %v1413_v26, %v1413_v26  ;;  %v1550_v10 = vsel %vm1048_vm6, %v1413_v26, 0.0  ;;  %v1570_v56 = vsel %vm1048_vm6, %v2890_v36, 0.0 }
 0x231   : > { %v1551_v3 = vadd.f32 %v1550_v10, %v1549_v46  ;;  %v1619_v26 = vmul.f32 %v2904_v28, %v2904_v28 }
 0x232   : > { %1505 = vst.msk [vmem:[%s2755_s11 + $0x38] sm:$0xf] %vm1490_vm15, %v1472_v23  ;;  %v1653_v42 = vsel %vm1048_vm6, %v1608_v20, 0.0 }
 0x233   : > { %v1654_v40 = vadd.f32 %v1653_v42, %v1652_v45  ;;  %v1618_v45 = vmul.f32 %v2890_v36, %v2890_v36 }
 0x235   : > { %v1673_v42 = vsel %vm1048_vm6, %v1618_v45, 0.0 }
 0x237   : > { %v1415_v33 = vpop.f32.mrf.mxu1 }
 0x238   : > { %v1473_v44 = vpack.c.bf16 %v1415_v33, %v1415_v33  ;;  %v1552_v24 = vsel %vm1048_vm6, %v1415_v33, 0.0  ;;  %v1609_v25 = vmul.f32 %v1415_v33, %v1415_v33  ;;  %v1620_v33 = vmul.f32 %v2948_v54, %v2948_v54 }
 0x239   : > { %v1553_v59 = vadd.f32 %v1552_v24, %v1551_v3  ;;  %v1572_v3 = vsel %vm1048_vm6, %v2904_v28, 0.0  ;;  %v1574_v24 = vsel %vm1048_vm6, %v2948_v54, 0.0  ;;  %v1621_v28 = vmul.f32 %v2956_v16, %v2956_v16 }
 0x23a   : > { %1506 = vst.msk [vmem:[%s2755_s11 + $0x3c] sm:$0xf] %vm1490_vm15, %v1473_v44  ;;  %v1655_v6 = vsel %vm1048_vm6, %v1609_v25, 0.0  ;;  %v1675_v44 = vsel %vm1048_vm6, %v1619_v26, 0.0  ;;  %v1677_v11 = vsel %vm1048_vm6, %v1620_v33, 0.0 }
 0x23b   : > { %v1555_v62 = vadd.f32 %v1554_v32, %v1553_v59  ;;  %v1656_v39 = vadd.f32 %v1655_v6, %v1654_v40 }
 0x23d   : > { %v1557_v27 = vadd.f32 %v1556_v34, %v1555_v62  ;;  %v1658_v43 = vadd.f32 %v1657_v21, %v1656_v39  ;;  %v1576_v62 = vsel %vm1048_vm6, %v2956_v16, 0.0  ;;  %v1679_v21 = vsel %vm1048_vm6, %v1621_v28, 0.0 }
 0x23f   : > { %v1559_v17 = vadd.f32 %v1558_v53, %v1557_v27  ;;  %v1660_v13 = vadd.f32 %v1659_v7, %v1658_v43 }
 0x241   : > { %v1662_v0 = vadd.f32 %v1661_v14, %v1660_v13  ;;  %v1561_v61 = vadd.f32 %v1560_v15, %v1559_v17 }
 0x243   : > { %v1664_v30 = vadd.f32 %v1663_v35, %v1662_v0  ;;  %v1563_v4 = vadd.f32 %v1562_v58, %v1561_v61 }
 0x245   : > { %v1666_v29 = vadd.f32 %v1665_v52, %v1664_v30  ;;  %v1565_v31 = vadd.f32 %v1564_v41, %v1563_v4 }
 0x247   : > { %v1668_v46 = vadd.f32 %v1667_v37, %v1666_v29 }
 0x24e   : > { %v1433_v12 = vpop.f32.mrf.mxu2 }
 0x24f   : > { %v1480_v55 = vpack.c.bf16 %v1433_v12, %v1433_v12  ;;  %v1616_v2 = vmul.f32 %v1433_v12, %v1433_v12  ;;  %v1566_v9 = vsel %vm1048_vm6, %v1433_v12, 0.0 }
 0x250   : > { %v1567_v1 = vadd.f32 %v1566_v9, %v1565_v31 }
 0x251   : > { %1513 = vst.msk [vmem:[%s2755_s11 + $0x58] sm:$0xf] %vm1490_vm15, %v1480_v55  ;;  %v1669_v19 = vsel %vm1048_vm6, %v1616_v2, 0.0 }
 0x252   : > { %v1670_v18 = vadd.f32 %v1669_v19, %v1668_v46 }
 0x255   : > { %v1448_v8 = vpop.f32.mrf.mxu3 }
 0x256   : > { %v1486_v50 = vpack.c.bf16 %v1448_v8, %v1448_v8  ;;  %v1435_v38 = vpop.f32.mrf.mxu2  ;;  %v1622_v54 = vmul.f32 %v1448_v8, %v1448_v8  ;;  %v1578_v27 = vsel %vm1048_vm6, %v1448_v8, 0.0 }
 0x257   : > { %v1481_v47 = vpack.c.bf16 %v1435_v38, %v1435_v38  ;;  %v1568_v51 = vsel %vm1048_vm6, %v1435_v38, 0.0  ;;  %v1617_v22 = vmul.f32 %v1435_v38, %v1435_v38 }
 0x258   : > { %1519 = vst.msk [vmem:[%s2755_s11 + $0x70] sm:$0xf] %vm1490_vm15, %v1486_v50  ;;  %v1569_v5 = vadd.f32 %v1568_v51, %v1567_v1  ;;  %v1681_v53 = vsel %vm1048_vm6, %v1622_v54, 0.0 }
 0x259   : > { %1514 = vst.msk [vmem:[%s2755_s11 + $0x5c] sm:$0xf] %vm1490_vm15, %v1481_v47  ;;  %v1671_v23 = vsel %vm1048_vm6, %v1617_v22, 0.0 }
 0x25a   : > { %v1571_v20 = vadd.f32 %v1570_v56, %v1569_v5  ;;  %v1672_v10 = vadd.f32 %v1671_v23, %v1670_v18 }
 0x25c   : > { %v1573_v48 = vadd.f32 %v1572_v3, %v1571_v20  ;;  %v1674_v36 = vadd.f32 %v1673_v42, %v1672_v10 }
 0x25d   : > { %v1450_v25 = vpop.f32.mrf.mxu3 }
 0x25e   : > { %v1575_v40 = vadd.f32 %v1574_v24, %v1573_v48  ;;  %v1676_v59 = vadd.f32 %v1675_v44, %v1674_v36  ;;  %v1487_v32 = vpack.c.bf16 %v1450_v25, %v1450_v25  ;;  %v1623_v63 = vmul.f32 %v1450_v25, %v1450_v25 }
 0x25f   : > { %v1580_v16 = vsel %vm1048_vm6, %v1450_v25, 0.0 }
 0x260   : > { %v1678_v6 = vadd.f32 %v1677_v11, %v1676_v59  ;;  %1520 = vst.msk [vmem:[%s2755_s11 + $0x74] sm:$0xf] %vm1490_vm15, %v1487_v32  ;;  %v1577_v39 = vadd.f32 %v1576_v62, %v1575_v40  ;;  %v1683_v0 = vsel %vm1048_vm6, %v1623_v63, 0.0 }
 0x262   : > { %v1680_v34 = vadd.f32 %v1679_v21, %v1678_v6  ;;  %v1579_v7 = vadd.f32 %v1578_v27, %v1577_v39 }
 0x264   : > { %v1682_v13 = vadd.f32 %v1681_v53, %v1680_v34  ;;  %v1581_v15 = vadd.f32 %v1580_v16, %v1579_v7 }
 0x266   : > { %v1684_v35 = vadd.f32 %v1683_v0, %v1682_v13 }
 0x26a   : > { %v1453_v49 = vpop.f32.mrf.mxu3 }
 0x26b   : > { %v1488_v43 = vpack.c.bf16 %v1453_v49, %v1453_v49  ;;  %v1624_v17 = vmul.f32 %v1453_v49, %v1453_v49  ;;  %v1582_v14 = vsel %vm1048_vm6, %v1453_v49, 0.0 }
 0x26c   : > { %v1583_v30 = vadd.f32 %v1582_v14, %v1581_v15 }
 0x26d   : > { %1521 = vst.msk [vmem:[%s2755_s11 + $0x78] sm:$0xf] %vm1490_vm15, %v1488_v43  ;;  %v1685_v61 = vsel %vm1048_vm6, %v1624_v17, 0.0 }
 0x26e   : > { %v1686_v4 = vadd.f32 %v1685_v61, %v1684_v35 }
 0x272   : > { %v1455_v60 = vpop.f32.mrf.mxu3 }
 0x273   : > { %v1489_v12 = vpack.c.bf16 %v1455_v60, %v1455_v60  ;;  %v1584_v58 = vsel %vm1048_vm6, %v1455_v60, 0.0  ;;  %v1625_v55 = vmul.f32 %v1455_v60, %v1455_v60 }
 0x274   : > { %v1585_v52 = vadd.f32 %v1584_v58, %v1583_v30 }
 0x275   : > { %1522 = vst.msk [vmem:[%s2755_s11 + $0x7c] sm:$0xf] %vm1490_vm15, %v1489_v12  ;;  %v1687_v57 = vsel %vm1048_vm6, %v1625_v55, 0.0 }
 0x276   : > { %v1586_v2 = vrot.slane %v1585_v52, 4  ;;  %v1688_v29 = vadd.f32 %v1687_v57, %v1686_v4 }
 0x278   : > { %v1587_v41 = vadd.f32 %v1586_v2, %v1585_v52  ;;  %v1689_v9 = vrot.slane %v1688_v29, 4 }
 0x27a   : > { %v1588_v31 = vrot.slane %v1587_v41, 2  ;;  %v1690_v37 = vadd.f32 %v1689_v9, %v1688_v29 }
 0x27c   : > { %v1589_v19 = vadd.f32 %v1588_v31, %v1587_v41  ;;  %v1691_v8 = vrot.slane %v1690_v37, 2 }
 0x27e   : > { %v1590_v1 = vrot.slane %v1589_v19, 1  ;;  %v1692_v46 = vadd.f32 %v1691_v8, %v1690_v37 }
 0x280   : > { %v1591_v50 = vadd.f32 %v1590_v1, %v1589_v19  ;;  %v1693_v38 = vrot.slane %v1692_v46, 1 }
 0x282   : > { %1593 = vst.msk [vmem:[%s211_s14] sm:$0x1] %vm1592_vm0, %v1591_v50  ;;  %v1694_v45 = vadd.f32 %v1693_v38, %v1692_v46 }
 0x284   : > { %1695 = vst.msk [vmem:[%s214_s19] sm:$0x1] %vm1592_vm0, %v1694_v45 }
 0x285 PF: > { %s15_s15 = sadd.s32 1, %s1952_s15  }
 0x286   : > { %p12_p4 = scmp.ge.s32.totalorder %s15_s15, 4  }
 0x288   :  { %14 = sbr.rel (!%p12_p4) target bundleno = 1 (0x1), region = 82 }

</bundles_post_ra>
